<compile_context>
chip_gen: v5e
topology: v5e:2x2
jax: 0.10.0
libtpu: 0.0.40
codegen_flags: <defaults>
</compile_context>

<pallas_src>
import jax
import jax.numpy as jnp
from jax.experimental import pallas as pl
from jax.experimental.pallas import tpu as pltpu

# Plain Python floats: fold as literals inside the kernel (no captured consts).
_BIG = 1e30
_INV_SQRT2 = 0.7071067811865476


def gnn_kernel(xall_ref, adj_ref, invdeg_ref, memb_ref, invcnt_ref,
               wcat_ref, bl_ref, wlin_ref, blin_ref,
               out_ref, sum_acc, min_acc, max_acc):
    i = pl.program_id(0)
    tm = adj_ref.shape[0]

    @pl.when(i == 0)
    def _init():
        sum_acc[...] = jnp.zeros_like(sum_acc)
        min_acc[...] = jnp.full_like(min_acc, _BIG)
        max_acc[...] = jnp.full_like(max_acc, -_BIG)

    # --- SAGEConv on this node row-block (bf16 MXU, f32 accumulate) ---------
    # adj holds raw neighbor counts (exact in bf16); normalize afterwards in f32.
    s = jnp.dot(adj_ref[...], xall_ref[...],
                preferred_element_type=jnp.float32)            # (TM, FP) f32
    neigh = s * invdeg_ref[...]                                # row-scale 1/in_deg

    # Root-feature block read from the already-resident full-x ref (no 2nd DMA).
    xblk = xall_ref[pl.ds(pl.multiple_of(i * tm, tm), tm), :]  # (TM, FP) bf16

    # Fused feature matmul: [neigh | x_blk] @ [w_l ; w_r]  (single MXU issue).
    feat = jnp.concatenate([neigh.astype(jnp.bfloat16), xblk], axis=-1)
    h = (jnp.dot(feat, wcat_ref[...], preferred_element_type=jnp.float32)
         + bl_ref[...])                                        # (TM, HP) f32

    # exact (erf) GELU, f32 epilogue
    h = 0.5 * h * (1.0 + jax.lax.erf(h * _INV_SQRT2))

    # --- per-graph pooled stats accumulated across node blocks -------------
    memb = memb_ref[...]                                       # (TM, G) f32 one-hot
    num_graphs = memb.shape[1]                                 # small, static

    # Sum pool on the MXU: (G, TM) @ (TM, HP) via lhs-contracted dot_general,
    # kept in f32 so the mean-pool accumulation loses no precision.
    sum_acc[...] = sum_acc[...] + jax.lax.dot_general(
        memb, h, dimension_numbers=(((0,), (0,)), ((), ())),
        preferred_element_type=jnp.float32)                    # (G, HP)

    # Block-level per-graph min/max built in registers, then a single
    # whole-tile read-modify-write of each accumulator.
    mins = []
    maxs = []
    for g in range(num_graphs):
        m = memb[:, g:g + 1] > 0.0                             # (TM, 1) bool
        mins.append(jnp.min(jnp.where(m, h, _BIG), axis=0, keepdims=True))
        maxs.append(jnp.max(jnp.where(m, h, -_BIG), axis=0, keepdims=True))
    min_acc[...] = jnp.minimum(min_acc[...], jnp.concatenate(mins, axis=0))
    max_acc[...] = jnp.maximum(max_acc[...], jnp.concatenate(maxs, axis=0))

    # --- finalize: pooled -> Linear (no concat; three H-sized slabs) -------
    @pl.when(i == pl.num_programs(0) - 1)
    def _fin():
        inv_cnt = invcnt_ref[...]                              # (G, 1); 0 if empty
        nonempty = inv_cnt > 0.0
        mean = sum_acc[...] * inv_cnt
        mn = jnp.where(nonempty, min_acc[...], 0.0)
        mx = jnp.where(nonempty, max_acc[...], 0.0)
        out_ref[...] = (
            jnp.dot(mean, wlin_ref[0], preferred_element_type=jnp.float32)
            + jnp.dot(mn, wlin_ref[1], preferred_element_type=jnp.float32)
            + jnp.dot(mx, wlin_ref[2], preferred_element_type=jnp.float32)
            + blin_ref[...])


def _round_up(v, m):
    return (v + m - 1) // m * m


def _pad2(a, shape):
    return jnp.pad(a, [(0, t - s) for s, t in zip(a.shape, shape)])


def graph_level_gnn(x, edge_index, batch, params, num_graphs, *, block_nodes=128):
    """x: (N, F) f32, edge_index: (2, E) int32 (src, dst), batch: (N,) int32."""
    N, f_in = x.shape
    hidden = params["w_l"].shape[1]
    num_classes = params["w_lin"].shape[1]
    G = num_graphs

    # Padded sizes: lane dims -> multiples of 128, node dim -> multiple of TM.
    FP = _round_up(f_in, 128)
    HP = _round_up(hidden, 128)
    CP = _round_up(num_classes, 128)
    TM = _round_up(block_nodes, 16)        # bf16 sublane packing
    NP = _round_up(N, TM)

    src, dst = edge_index[0], edge_index[1]
    # Unnormalized neighbor-count adjacency (exact in bf16); 1/in_degree in f32.
    adj_cnt = jnp.zeros((NP, NP), jnp.float32).at[dst, src].add(1.0)
    deg = adj_cnt.sum(axis=1, keepdims=True)
    inv_deg = jnp.where(deg > 0, 1.0 / deg, 0.0).astype(jnp.float32)   # (NP, 1)

    # Graph membership (node-major) and inverse node counts (0 for empty graphs).
    memb = (batch[:, None] == jnp.arange(G)[None, :]).astype(jnp.float32)
    memb = _pad2(memb, (NP, G))                                        # (NP, G)
    cnt = memb.sum(axis=0)[:, None]
    inv_cnt = jnp.where(cnt > 0, 1.0 / cnt, 0.0).astype(jnp.float32)   # (G, 1)

    # bf16 matmul operands (counts / features / weights), f32 elsewhere.
    xp = _pad2(x, (NP, FP)).astype(jnp.bfloat16)
    adj_b = adj_cnt.astype(jnp.bfloat16)
    wl = _pad2(params["w_l"], (FP, HP))
    wr = _pad2(params["w_r"], (FP, HP))
    wcat = jnp.concatenate([wl, wr], axis=0).astype(jnp.bfloat16)      # (2*FP, HP)
    bl = _pad2(params["b_l"], (1, HP)).astype(jnp.float32)
    w_lin = params["w_lin"]
    wlin3 = jnp.stack([_pad2(w_lin[k * hidden:(k + 1) * hidden], (HP, CP))
                       for k in range(3)]).astype(jnp.float32)         # (3, HP, CP)
    blin = _pad2(params["b_lin"], (1, CP)).astype(jnp.float32)

    grid = (NP // TM,)

    out = pl.pallas_call(
        gnn_kernel,
        out_shape=jax.ShapeDtypeStruct((G, CP), jnp.float32),
        grid_spec=pltpu.PrefetchScalarGridSpec(
            num_scalar_prefetch=0,
            grid=grid,
            in_specs=[
                pl.BlockSpec((NP, FP), lambda i: (0, 0)),        # x (full, contraction + root slices)
                pl.BlockSpec((TM, NP), lambda i: (i, 0)),        # adjacency row block
                pl.BlockSpec((TM, 1), lambda i: (i, 0)),         # 1/in_degree
                pl.BlockSpec((TM, G), lambda i: (i, 0)),         # graph membership
                pl.BlockSpec((G, 1), lambda i: (0, 0)),          # 1/|graph|
                pl.BlockSpec((2 * FP, HP), lambda i: (0, 0)),    # [w_l ; w_r]
                pl.BlockSpec((1, HP), lambda i: (0, 0)),         # b_l
                pl.BlockSpec((3, HP, CP), lambda i: (0, 0, 0)),  # w_lin slabs
                pl.BlockSpec((1, CP), lambda i: (0, 0)),         # b_lin
            ],
            out_specs=pl.BlockSpec((G, CP), lambda i: (0, 0)),
            scratch_shapes=[pltpu.VMEM((G, HP), jnp.float32)] * 3,
        ),
        compiler_params=pltpu.CompilerParams(
            dimension_semantics=("arbitrary",),   # pooling accumulators carry
            vmem_limit_bytes=48 << 20),           # raise to 64-96 MiB on v5e/v6e
    )(xp, adj_b, inv_deg, memb, inv_cnt, wcat, bl, wlin3, blin)

    return out[:, :num_classes]


def reference_forward(x, edge_index, batch, params, num_graphs):
    """Pure-JAX f32 reference (PyG semantics) for sanity checking."""
    N = x.shape[0]
    src, dst = edge_index[0], edge_index[1]
    adj = jnp.zeros((N, N), jnp.float32).at[dst, src].add(1.0)
    adj = adj / jnp.maximum(adj.sum(axis=1, keepdims=True), 1.0)
    neigh = adj @ x
    h = neigh @ params["w_l"] + params["b_l"] + x @ params["w_r"]
    h = 0.5 * h * (1.0 + jax.lax.erf(h / jnp.sqrt(2.0)))
    mask = (batch[None, :] == jnp.arange(num_graphs)[:, None]).astype(jnp.float32)
    cnt = jnp.maximum(mask.sum(axis=1, keepdims=True), 1.0)
    mean = (mask @ h) / cnt
    big = 1e30
    mn = jnp.min(jnp.where(mask[:, :, None] > 0, h[None], big), axis=1)
    mx = jnp.max(jnp.where(mask[:, :, None] > 0, h[None], -big), axis=1)
    pooled = jnp.concatenate([mean, mn, mx], axis=1)
    return pooled @ params["w_lin"] + params["b_lin"]


def init_params(key, in_features, hidden, num_classes):
    k1, k2, k3, k4, k5 = jax.random.split(key, 5)
    scale_in = 1.0 / jnp.sqrt(jnp.float32(in_features))
    scale_h = 1.0 / jnp.sqrt(jnp.float32(hidden * 3))
    return {
        # SAGEConv: lin_l (neighbor path, has bias), lin_r (root path, no bias)
        "w_l": jax.random.normal(k1, (in_features, hidden), jnp.float32) * scale_in,
        "b_l": jax.random.normal(k2, (1, hidden), jnp.float32) * 0.01,
        "w_r": jax.random.normal(k3, (in_features, hidden), jnp.float32) * scale_in,
        # final Linear(hidden*3, num_classes) with bias
        "w_lin": jax.random.normal(k4, (hidden * 3, num_classes), jnp.float32) * scale_h,
        "b_lin": jax.random.normal(k5, (1, num_classes), jnp.float32) * 0.01,
    }


if __name__ == "__main__":
    key = jax.random.PRNGKey(0)
    kx, kp = jax.random.split(key)

    NODES_PER_GRAPH = 16
    NUM_GRAPHS = 2
    N = NODES_PER_GRAPH * NUM_GRAPHS     # 32 nodes (padded to one TM=128 block)
    F_IN = 8
    HIDDEN = 32
    NUM_CLASSES = 2

    x = jax.random.normal(kx, (N, F_IN), jnp.float32)

    # Two 16-node ring graphs (bidirectional edges), deterministic.
    edges = []
    for g in range(NUM_GRAPHS):
        base = g * NODES_PER_GRAPH
        for i in range(NODES_PER_GRAPH):
            a, b = base + i, base + (i + 1) % NODES_PER_GRAPH
            edges.append((a, b))
            edges.append((b, a))
    edge_index = jnp.array(edges, dtype=jnp.int32).T                  # (2, 64)
    batch = jnp.repeat(jnp.arange(NUM_GRAPHS, dtype=jnp.int32),
                       NODES_PER_GRAPH)                               # (32,)

    params = init_params(kp, F_IN, HIDDEN, NUM_CLASSES)

    out = graph_level_gnn(x, edge_index, batch, params, NUM_GRAPHS,
                          block_nodes=128)
    out = jax.block_until_ready(out)

    ref = reference_forward(x, edge_index, batch, params, NUM_GRAPHS)
    assert out.shape == (NUM_GRAPHS, NUM_CLASSES)
    # bf16 matmul operands (f32 accumulation) vs. f32 reference -> loose tolerance.
    err = float(jnp.max(jnp.abs(out - ref)))
    assert err < 1e-1, f"max abs err {err}"

    print("KERNEL_OK")
</pallas_src>

<mosaic_0001>
module attributes {stable_mosaic.version = 11 : i64} {
  func.func @gnn_kernel(%arg0: i32, %arg1: memref<128x128xbf16, #tpu.memory_space<vmem>>, %arg2: memref<128x128xbf16, #tpu.memory_space<vmem>>, %arg3: memref<128x1xf32, #tpu.memory_space<vmem>>, %arg4: memref<128x2xf32, #tpu.memory_space<vmem>>, %arg5: memref<2x1xf32, #tpu.memory_space<vmem>>, %arg6: memref<256x128xbf16, #tpu.memory_space<vmem>>, %arg7: memref<1x128xf32, #tpu.memory_space<vmem>>, %arg8: memref<3x128x128xf32, #tpu.memory_space<vmem>>, %arg9: memref<1x128xf32, #tpu.memory_space<vmem>>, %arg10: memref<2x128xf32, #tpu.memory_space<vmem>>, %arg11: memref<2x128xf32, #tpu.memory_space<vmem>>, %arg12: memref<2x128xf32, #tpu.memory_space<vmem>>, %arg13: memref<2x128xf32, #tpu.memory_space<vmem>>) attributes {dimension_semantics = [#tpu.dimension_semantics<arbitrary>], iteration_bounds = array<i64: 1>, scalar_prefetch = 0 : i64, scratch_operands = 3 : i64, tpu.core_type = #tpu.core_type<tc>, window_params = [{pipeline_mode = #tpu.pipeline_mode<synchronous>, transform_indices = @transform_0, window_bounds = array<i64: 128, 128>}, {transform_indices = @transform_1, window_bounds = array<i64: 128, 128>}, {transform_indices = @transform_2, window_bounds = array<i64: 128, 1>}, {transform_indices = @transform_3, window_bounds = array<i64: 128, 2>}, {pipeline_mode = #tpu.pipeline_mode<synchronous>, transform_indices = @transform_4, window_bounds = array<i64: 2, 1>}, {pipeline_mode = #tpu.pipeline_mode<synchronous>, transform_indices = @transform_5, window_bounds = array<i64: 256, 128>}, {pipeline_mode = #tpu.pipeline_mode<synchronous>, transform_indices = @transform_6, window_bounds = array<i64: 1, 128>}, {pipeline_mode = #tpu.pipeline_mode<synchronous>, transform_indices = @transform_7, window_bounds = array<i64: 3, 128, 128>}, {pipeline_mode = #tpu.pipeline_mode<synchronous>, transform_indices = @transform_8, window_bounds = array<i64: 1, 128>}, {pipeline_mode = #tpu.pipeline_mode<synchronous>, transform_indices = @transform_9, window_bounds = array<i64: 2, 128>}]} {
    %c0_i32 = arith.constant 0 : i32
    %0 = arith.cmpi eq, %arg0, %c0_i32 : i32
    %1 = arith.extui %0 : i1 to i32
    %c0_i32_0 = arith.constant 0 : i32
    %2 = arith.cmpi ne, %1, %c0_i32_0 : i32
    scf.if %2 {
      %cst_42 = arith.constant 0.000000e+00 : f32
      %74 = vector.broadcast %cst_42 : f32 to vector<2x128xf32>
      %c0_43 = arith.constant 0 : index
      %c0_44 = arith.constant 0 : index
      %75 = vector.load %arg11[%c0_43, %c0_44] : memref<2x128xf32, #tpu.memory_space<vmem>>, vector<2x128xf32>
      tpu.vector_store %arg11[%c0_43, %c0_44], %74 {strides = array<i32>} : memref<2x128xf32, #tpu.memory_space<vmem>>, vector<2x128xf32>,
      %cst_45 = arith.constant 1.000000e+30 : f32
      %76 = vector.broadcast %cst_45 : f32 to vector<2x128xf32>
      %c0_46 = arith.constant 0 : index
      %c0_47 = arith.constant 0 : index
      %77 = vector.load %arg12[%c0_46, %c0_47] : memref<2x128xf32, #tpu.memory_space<vmem>>, vector<2x128xf32>
      tpu.vector_store %arg12[%c0_46, %c0_47], %76 {strides = array<i32>} : memref<2x128xf32, #tpu.memory_space<vmem>>, vector<2x128xf32>,
      %cst_48 = arith.constant -1.000000e+30 : f32
      %78 = vector.broadcast %cst_48 : f32 to vector<2x128xf32>
      %c0_49 = arith.constant 0 : index
      %c0_50 = arith.constant 0 : index
      %79 = vector.load %arg13[%c0_49, %c0_50] : memref<2x128xf32, #tpu.memory_space<vmem>>, vector<2x128xf32>
      tpu.vector_store %arg13[%c0_49, %c0_50], %78 {strides = array<i32>} : memref<2x128xf32, #tpu.memory_space<vmem>>, vector<2x128xf32>,
    } else {
    }
    %c0 = arith.constant 0 : index
    %c0_1 = arith.constant 0 : index
    %3 = vector.load %arg2[%c0, %c0_1] : memref<128x128xbf16, #tpu.memory_space<vmem>>, vector<128x128xbf16>
    %c0_2 = arith.constant 0 : index
    %c0_3 = arith.constant 0 : index
    %4 = vector.load %arg1[%c0_2, %c0_3] : memref<128x128xbf16, #tpu.memory_space<vmem>>, vector<128x128xbf16>
    %cst = arith.constant dense<0.000000e+00> : vector<128x128xf32>
    %5 = tpu.matmul %3, %4, %cst {dimension_numbers = #tpu.dot_dimension_numbers<[1], [0], [0], [1], [0, 0, 1, 1], [], []>} : vector<128x128xbf16>, vector<128x128xbf16>, vector<128x128xf32> -> vector<128x128xf32>
    %c0_4 = arith.constant 0 : index
    %c0_5 = arith.constant 0 : index
    %6 = vector.load %arg3[%c0_4, %c0_5] : memref<128x1xf32, #tpu.memory_space<vmem>>, vector<128x1xf32>
    %7 = vector.broadcast %6 : vector<128x1xf32> to vector<128x128xf32>
    %8 = arith.mulf %5, %7 : vector<128x128xf32>
    %c128_i32 = arith.constant 128 : i32
    %9 = arith.muli %arg0, %c128_i32 : i32
    %10 = tpu.assume_multiple %9, 128 : i32
    %11 = arith.index_cast %10 : i32 to index
    %c0_6 = arith.constant 0 : index
    %12 = vector.load %arg1[%11, %c0_6] : memref<128x128xbf16, #tpu.memory_space<vmem>>, vector<128x128xbf16>
    %13 = arith.truncf %8 : vector<128x128xf32> to vector<128x128xbf16>
    %14 = tpu.concatenate %13, %12 in 1 : vector<128x128xbf16>, vector<128x128xbf16> -> vector<128x256xbf16>
    %c0_7 = arith.constant 0 : index
    %c0_8 = arith.constant 0 : index
    %15 = vector.load %arg6[%c0_7, %c0_8] : memref<256x128xbf16, #tpu.memory_space<vmem>>, vector<256x128xbf16>
    %cst_9 = arith.constant dense<0.000000e+00> : vector<128x128xf32>
    %16 = tpu.matmul %14, %15, %cst_9 {dimension_numbers = #tpu.dot_dimension_numbers<[1], [0], [0], [1], [0, 0, 1, 1], [], []>} : vector<128x256xbf16>, vector<256x128xbf16>, vector<128x128xf32> -> vector<128x128xf32>
    %c0_10 = arith.constant 0 : index
    %c0_11 = arith.constant 0 : index
    %17 = vector.load %arg7[%c0_10, %c0_11] : memref<1x128xf32, #tpu.memory_space<vmem>>, vector<1x128xf32>
    %18 = vector.broadcast %17 : vector<1x128xf32> to vector<128x128xf32>
    %19 = arith.addf %16, %18 : vector<128x128xf32>
    %cst_12 = arith.constant 5.000000e-01 : f32
    %20 = vector.broadcast %cst_12 : f32 to vector<128x128xf32>
    %21 = arith.mulf %20, %19 : vector<128x128xf32>
    %cst_13 = arith.constant 0.707106769 : f32
    %22 = vector.broadcast %cst_13 : f32 to vector<128x128xf32>
    %23 = arith.mulf %19, %22 : vector<128x128xf32>
    %24 = math.erf %23 : vector<128x128xf32>
    %cst_14 = arith.constant 1.000000e+00 : f32
    %25 = vector.broadcast %cst_14 : f32 to vector<128x128xf32>
    %26 = arith.addf %25, %24 : vector<128x128xf32>
    %27 = arith.mulf %21, %26 : vector<128x128xf32>
    %c0_15 = arith.constant 0 : index
    %c0_16 = arith.constant 0 : index
    %28 = vector.load %arg4[%c0_15, %c0_16] : memref<128x2xf32, #tpu.memory_space<vmem>>, vector<128x2xf32>
    %c0_17 = arith.constant 0 : index
    %c0_18 = arith.constant 0 : index
    %29 = vector.load %arg11[%c0_17, %c0_18] : memref<2x128xf32, #tpu.memory_space<vmem>>, vector<2x128xf32>
    %cst_19 = arith.constant dense<0.000000e+00> : vector<2x128xf32>
    %30 = tpu.matmul %28, %27, %cst_19 {dimension_numbers = #tpu.dot_dimension_numbers<[0], [0], [1], [1], [0, 1, 1, 1], [], []>} : vector<128x2xf32>, vector<128x128xf32>, vector<2x128xf32> -> vector<2x128xf32>
    %31 = arith.addf %29, %30 : vector<2x128xf32>
    %c0_20 = arith.constant 0 : index
    %c0_21 = arith.constant 0 : index
    %32 = vector.load %arg11[%c0_20, %c0_21] : memref<2x128xf32, #tpu.memory_space<vmem>>, vector<2x128xf32>
    tpu.vector_store %arg11[%c0_20, %c0_21], %31 {strides = array<i32>} : memref<2x128xf32, #tpu.memory_space<vmem>>, vector<2x128xf32>,
    %33 = vector.extract_strided_slice %28 {offsets = [0, 0], sizes = [128, 1], strides = [1, 1]} : vector<128x2xf32> to vector<128x1xf32>
    %cst_22 = arith.constant 0.000000e+00 : f32
    %34 = vector.broadcast %cst_22 : f32 to vector<128x1xf32>
    %35 = arith.cmpf ogt, %33, %34 : vector<128x1xf32>
    %cst_23 = arith.constant 1.000000e+30 : f32
    %36 = vector.shape_cast %35 : vector<128x1xi1> to vector<128x1xi1>
    %37 = vector.broadcast %36 : vector<128x1xi1> to vector<128x128xi1>
    %38 = vector.broadcast %cst_23 : f32 to vector<128x128xf32>
    %39 = arith.select %37, %27, %38 : vector<128x128xi1>, vector<128x128xf32>
    %cst_24 = arith.constant dense<0x7F800000> : vector<128xf32>
    %40 = vector.multi_reduction <minimumf>, %39, %cst_24 [0] : vector<128x128xf32> to vector<128xf32>
    %41 = vector.shape_cast %40 : vector<128xf32> to vector<1x128xf32>
    %cst_25 = arith.constant -1.000000e+30 : f32
    %42 = vector.shape_cast %35 : vector<128x1xi1> to vector<128x1xi1>
    %43 = vector.broadcast %42 : vector<128x1xi1> to vector<128x128xi1>
    %44 = vector.broadcast %cst_25 : f32 to vector<128x128xf32>
    %45 = arith.select %43, %27, %44 : vector<128x128xi1>, vector<128x128xf32>
    %cst_26 = arith.constant dense<0xFF800000> : vector<128xf32>
    %46 = vector.multi_reduction <maximumf>, %45, %cst_26 [0] : vector<128x128xf32> to vector<128xf32>
    %47 = vector.shape_cast %46 : vector<128xf32> to vector<1x128xf32>
    %48 = vector.extract_strided_slice %28 {offsets = [0, 1], sizes = [128, 1], strides = [1, 1]} : vector<128x2xf32> to vector<128x1xf32>
    %cst_27 = arith.constant 0.000000e+00 : f32
    %49 = vector.broadcast %cst_27 : f32 to vector<128x1xf32>
    %50 = arith.cmpf ogt, %48, %49 : vector<128x1xf32>
    %cst_28 = arith.constant 1.000000e+30 : f32
    %51 = vector.shape_cast %50 : vector<128x1xi1> to vector<128x1xi1>
    %52 = vector.broadcast %51 : vector<128x1xi1> to vector<128x128xi1>
    %53 = vector.broadcast %cst_28 : f32 to vector<128x128xf32>
    %54 = arith.select %52, %27, %53 : vector<128x128xi1>, vector<128x128xf32>
    %cst_29 = arith.constant dense<0x7F800000> : vector<128xf32>
    %55 = vector.multi_reduction <minimumf>, %54, %cst_29 [0] : vector<128x128xf32> to vector<128xf32>
    %56 = vector.shape_cast %55 : vector<128xf32> to vector<1x128xf32>
    %cst_30 = arith.constant -1.000000e+30 : f32
    %57 = vector.shape_cast %50 : vector<128x1xi1> to vector<128x1xi1>
    %58 = vector.broadcast %57 : vector<128x1xi1> to vector<128x128xi1>
    %59 = vector.broadcast %cst_30 : f32 to vector<128x128xf32>
    %60 = arith.select %58, %27, %59 : vector<128x128xi1>, vector<128x128xf32>
    %cst_31 = arith.constant dense<0xFF800000> : vector<128xf32>
    %61 = vector.multi_reduction <maximumf>, %60, %cst_31 [0] : vector<128x128xf32> to vector<128xf32>
    %62 = vector.shape_cast %61 : vector<128xf32> to vector<1x128xf32>
    %c0_32 = arith.constant 0 : index
    %c0_33 = arith.constant 0 : index
    %63 = vector.load %arg12[%c0_32, %c0_33] : memref<2x128xf32, #tpu.memory_space<vmem>>, vector<2x128xf32>
    %64 = tpu.concatenate %41, %56 in 0 : vector<1x128xf32>, vector<1x128xf32> -> vector<2x128xf32>
    %65 = arith.minimumf %63, %64 : vector<2x128xf32>
    %c0_34 = arith.constant 0 : index
    %c0_35 = arith.constant 0 : index
    %66 = vector.load %arg12[%c0_34, %c0_35] : memref<2x128xf32, #tpu.memory_space<vmem>>, vector<2x128xf32>
    tpu.vector_store %arg12[%c0_34, %c0_35], %65 {strides = array<i32>} : memref<2x128xf32, #tpu.memory_space<vmem>>, vector<2x128xf32>,
    %c0_36 = arith.constant 0 : index
    %c0_37 = arith.constant 0 : index
    %67 = vector.load %arg13[%c0_36, %c0_37] : memref<2x128xf32, #tpu.memory_space<vmem>>, vector<2x128xf32>
    %68 = tpu.concatenate %47, %62 in 0 : vector<1x128xf32>, vector<1x128xf32> -> vector<2x128xf32>
    %69 = arith.maximumf %67, %68 : vector<2x128xf32>
    %c0_38 = arith.constant 0 : index
    %c0_39 = arith.constant 0 : index
    %70 = vector.load %arg13[%c0_38, %c0_39] : memref<2x128xf32, #tpu.memory_space<vmem>>, vector<2x128xf32>
    tpu.vector_store %arg13[%c0_38, %c0_39], %69 {strides = array<i32>} : memref<2x128xf32, #tpu.memory_space<vmem>>, vector<2x128xf32>,
    %c0_i32_40 = arith.constant 0 : i32
    %71 = arith.cmpi eq, %arg0, %c0_i32_40 : i32
    %72 = arith.extui %71 : i1 to i32
    %c0_i32_41 = arith.constant 0 : i32
    %73 = arith.cmpi ne, %72, %c0_i32_41 : i32
    scf.if %73 {
      %c0_42 = arith.constant 0 : index
      %c0_43 = arith.constant 0 : index
      %74 = vector.load %arg5[%c0_42, %c0_43] : memref<2x1xf32, #tpu.memory_space<vmem>>, vector<2x1xf32>
      %cst_44 = arith.constant 0.000000e+00 : f32
      %75 = vector.broadcast %cst_44 : f32 to vector<2x1xf32>
      %76 = arith.cmpf ogt, %74, %75 : vector<2x1xf32>
      %c0_45 = arith.constant 0 : index
      %c0_46 = arith.constant 0 : index
      %77 = vector.load %arg11[%c0_45, %c0_46] : memref<2x128xf32, #tpu.memory_space<vmem>>, vector<2x128xf32>
      %78 = vector.broadcast %74 : vector<2x1xf32> to vector<2x128xf32>
      %79 = arith.mulf %77, %78 : vector<2x128xf32>
      %c0_47 = arith.constant 0 : index
      %c0_48 = arith.constant 0 : index
      %80 = vector.load %arg12[%c0_47, %c0_48] : memref<2x128xf32, #tpu.memory_space<vmem>>, vector<2x128xf32>
      %cst_49 = arith.constant 0.000000e+00 : f32
      %81 = vector.shape_cast %76 : vector<2x1xi1> to vector<2x1xi1>
      %82 = vector.broadcast %81 : vector<2x1xi1> to vector<2x128xi1>
      %83 = vector.broadcast %cst_49 : f32 to vector<2x128xf32>
      %84 = arith.select %82, %80, %83 : vector<2x128xi1>, vector<2x128xf32>
      %c0_50 = arith.constant 0 : index
      %c0_51 = arith.constant 0 : index
      %85 = vector.load %arg13[%c0_50, %c0_51] : memref<2x128xf32, #tpu.memory_space<vmem>>, vector<2x128xf32>
      %cst_52 = arith.constant 0.000000e+00 : f32
      %86 = vector.shape_cast %76 : vector<2x1xi1> to vector<2x1xi1>
      %87 = vector.broadcast %86 : vector<2x1xi1> to vector<2x128xi1>
      %88 = vector.broadcast %cst_52 : f32 to vector<2x128xf32>
      %89 = arith.select %87, %85, %88 : vector<2x128xi1>, vector<2x128xf32>
      %c0_53 = arith.constant 0 : index
      %c0_54 = arith.constant 0 : index
      %c0_55 = arith.constant 0 : index
      %90 = vector.load %arg8[%c0_53, %c0_54, %c0_55] : memref<3x128x128xf32, #tpu.memory_space<vmem>>, vector<1x128x128xf32>
      %91 = vector.shape_cast %90 : vector<1x128x128xf32> to vector<128x128xf32>
      %cst_56 = arith.constant dense<0.000000e+00> : vector<2x128xf32>
      %92 = tpu.matmul %79, %91, %cst_56 {dimension_numbers = #tpu.dot_dimension_numbers<[1], [0], [0], [1], [0, 0, 1, 1], [], []>} : vector<2x128xf32>, vector<128x128xf32>, vector<2x128xf32> -> vector<2x128xf32>
      %c1 = arith.constant 1 : index
      %c0_57 = arith.constant 0 : index
      %c0_58 = arith.constant 0 : index
      %93 = vector.load %arg8[%c1, %c0_57, %c0_58] : memref<3x128x128xf32, #tpu.memory_space<vmem>>, vector<1x128x128xf32>
      %94 = vector.shape_cast %93 : vector<1x128x128xf32> to vector<128x128xf32>
      %cst_59 = arith.constant dense<0.000000e+00> : vector<2x128xf32>
      %95 = tpu.matmul %84, %94, %cst_59 {dimension_numbers = #tpu.dot_dimension_numbers<[1], [0], [0], [1], [0, 0, 1, 1], [], []>} : vector<2x128xf32>, vector<128x128xf32>, vector<2x128xf32> -> vector<2x128xf32>
      %96 = arith.addf %92, %95 : vector<2x128xf32>
      %c2 = arith.constant 2 : index
      %c0_60 = arith.constant 0 : index
      %c0_61 = arith.constant 0 : index
      %97 = vector.load %arg8[%c2, %c0_60, %c0_61] : memref<3x128x128xf32, #tpu.memory_space<vmem>>, vector<1x128x128xf32>
      %98 = vector.shape_cast %97 : vector<1x128x128xf32> to vector<128x128xf32>
      %cst_62 = arith.constant dense<0.000000e+00> : vector<2x128xf32>
      %99 = tpu.matmul %89, %98, %cst_62 {dimension_numbers = #tpu.dot_dimension_numbers<[1], [0], [0], [1], [0, 0, 1, 1], [], []>} : vector<2x128xf32>, vector<128x128xf32>, vector<2x128xf32> -> vector<2x128xf32>
      %100 = arith.addf %96, %99 : vector<2x128xf32>
      %c0_63 = arith.constant 0 : index
      %c0_64 = arith.constant 0 : index
      %101 = vector.load %arg9[%c0_63, %c0_64] : memref<1x128xf32, #tpu.memory_space<vmem>>, vector<1x128xf32>
      %102 = vector.broadcast %101 : vector<1x128xf32> to vector<2x128xf32>
      %103 = arith.addf %100, %102 : vector<2x128xf32>
      %c0_65 = arith.constant 0 : index
      %c0_66 = arith.constant 0 : index
      %104 = vector.load %arg10[%c0_65, %c0_66] : memref<2x128xf32, #tpu.memory_space<vmem>>, vector<2x128xf32>
      tpu.vector_store %arg10[%c0_65, %c0_66], %103 {strides = array<i32>} : memref<2x128xf32, #tpu.memory_space<vmem>>, vector<2x128xf32>,
    } else {
    }
    return
  }
  func.func @transform_0(%arg0: i32) -> (i32, i32) {
    %c0_i32 = arith.constant 0 : i32
    %c0_i32_0 = arith.constant 0 : i32
    %c0_i32_1 = arith.constant 0 : i32
    return %c0_i32, %c0_i32_0 : i32, i32
  }
  func.func @transform_1(%arg0: i32) -> (i32, i32) {
    %c0_i32 = arith.constant 0 : i32
    %c0_i32_0 = arith.constant 0 : i32
    return %arg0, %c0_i32 : i32, i32
  }
  func.func @transform_2(%arg0: i32) -> (i32, i32) {
    %c0_i32 = arith.constant 0 : i32
    %c0_i32_0 = arith.constant 0 : i32
    return %arg0, %c0_i32 : i32, i32
  }
  func.func @transform_3(%arg0: i32) -> (i32, i32) {
    %c0_i32 = arith.constant 0 : i32
    %c0_i32_0 = arith.constant 0 : i32
    return %arg0, %c0_i32 : i32, i32
  }
  func.func @transform_4(%arg0: i32) -> (i32, i32) {
    %c0_i32 = arith.constant 0 : i32
    %c0_i32_0 = arith.constant 0 : i32
    %c0_i32_1 = arith.constant 0 : i32
    return %c0_i32, %c0_i32_0 : i32, i32
  }
  func.func @transform_5(%arg0: i32) -> (i32, i32) {
    %c0_i32 = arith.constant 0 : i32
    %c0_i32_0 = arith.constant 0 : i32
    %c0_i32_1 = arith.constant 0 : i32
    return %c0_i32, %c0_i32_0 : i32, i32
  }
  func.func @transform_6(%arg0: i32) -> (i32, i32) {
    %c0_i32 = arith.constant 0 : i32
    %c0_i32_0 = arith.constant 0 : i32
    %c0_i32_1 = arith.constant 0 : i32
    return %c0_i32, %c0_i32_0 : i32, i32
  }
  func.func @transform_7(%arg0: i32) -> (i32, i32, i32) {
    %c0_i32 = arith.constant 0 : i32
    %c0_i32_0 = arith.constant 0 : i32
    %c0_i32_1 = arith.constant 0 : i32
    %c0_i32_2 = arith.constant 0 : i32
    return %c0_i32, %c0_i32_0, %c0_i32_1 : i32, i32, i32
  }
  func.func @transform_8(%arg0: i32) -> (i32, i32) {
    %c0_i32 = arith.constant 0 : i32
    %c0_i32_0 = arith.constant 0 : i32
    %c0_i32_1 = arith.constant 0 : i32
    return %c0_i32, %c0_i32_0 : i32, i32
  }
  func.func @transform_9(%arg0: i32) -> (i32, i32) {
    %c0_i32 = arith.constant 0 : i32
    %c0_i32_0 = arith.constant 0 : i32
    %c0_i32_1 = arith.constant 0 : i32
    return %c0_i32, %c0_i32_0 : i32, i32
  }
}

</mosaic_0001>

<bundles_post_ra>
// kernel: tpu_custom_call.1
= control target key start
LH: loop header
LB: loop body
LE: loop exit
PB: predicated region body
PF: predicated region fallthrough
CT: control target
= control target key end

     0   :  { %14 = vsyncpa [#allocation6], 0  ;;  %s3635_s0 = inlined_call_operand.vmem [shape: bf16[128,128], index: 0, kind: input, shape index: {}]   ;;  %s3636_s1 = inlined_call_operand.vmem [shape: bf16[128,128], index: 1, kind: input, shape index: {}]   ;;  %s3637_s2 = inlined_call_operand.vmem [shape: f32[128,1], index: 2, kind: input, shape index: {}]   ;;  %s3638_s3 = inlined_call_operand.vmem [shape: f32[128,2], index: 3, kind: input, shape index: {}]   ;;  %s3639_s4 = inlined_call_operand.vmem [shape: f32[2,1], index: 4, kind: input, shape index: {}]   ;;  %s3640_s5 = inlined_call_operand.vmem [shape: bf16[256,128], index: 5, kind: input, shape index: {}]   ;;  %s3641_s6 = inlined_call_operand.vmem [shape: f32[1,128], index: 6, kind: input, shape index: {}]   ;;  %s3642_s7 = inlined_call_operand.hbm [shape: f32[3,128,128], index: 7, kind: input, shape index: {}]   ;;  %s3643_s8 = inlined_call_operand.vmem [shape: f32[1,128], index: 8, kind: input, shape index: {}]   ;;  %s3644_s9 = inlined_call_operand.hbm [shape: f32[2,128], index: 9, kind: output, shape index: {}]  }
   0x1   :  { %15 = vsyncpa [#allocation7], 0  ;;  %s34_s11 = sshll.u32 %s3642_s7, 4  ;;  %s2285_s12 = smov [#allocation5]   ;;  %s35_s11 = int_to_ptr.hbm [resolvable:$true] %s34_s11 }
   0x2   :  { %s36_s13 = sshll.u32 %s2285_s12, 4  ;;  %s2286_s14 = smov 128   ;;  %s37_s13 = int_to_ptr.vmem [resolvable:$true] %s36_s13 }
   0x3   :  { %s2287_s15 = smov 8  }
   0x4   :  { %42 = dma.hbm_to_vmem [thread:$0]  %s35_s11, 6144, %s37_s13, [#allocation6], %s2286_s14, %s2286_s14, %s2287_s15  }
   0x5   :  { %2281 = dma.done.wait [#allocation6], 6144  }
   0x6   :  { %2282 = vsyncadd [#allocation6], 4294961152  ;;  %v3645_v0 = vmov 0   ;;  %v233_v1 = vld [vmem:[%s3637_s2] sm:$0xff]  ;;  %v2150_v2 = vld [vmem:[%s3635_s0 + $0x38] sm:$0xff]  ;;  %s2293_s25 = smov [#allocation8]  }
   0x7   :  { %2187 = vset.pattern.permute.xlu0 %v3645_v0  ;;  %2188 = vset.pattern.permute.xlu1 %v3645_v0  ;;  %v2149_v3 = vld [vmem:[%s3635_s0 + $0x30] sm:$0xff]  ;;  %v234_v5 = vld [vmem:[%s3637_s2 + $0x8] sm:$0xff]  ;;  %v237_v6 = vld [vmem:[%s3637_s2 + $0x20] sm:$0xff] }
   0x8   :  { %2189 = vset.pattern.permute.xlu2 %v3645_v0  ;;  %251 = vperm.xlu0 %2187, %v233_v1   ;;  %v235_v4 = vld [vmem:[%s3637_s2 + $0x10] sm:$0xff]  ;;  %v2148_v7 = vld [vmem:[%s3635_s0 + $0x28] sm:$0xff]  ;;  %v236_v8 = vld [vmem:[%s3637_s2 + $0x18] sm:$0xff] }
   0x9   :  { %184 = vmatpush.bf16.msra.mxu0 %v2150_v2  ;;  %261 = vperm.xlu1 %2188, %v235_v4   ;;  %v2147_v9 = vld [vmem:[%s3635_s0 + $0x20] sm:$0xff]  ;;  %v238_v10 = vld [vmem:[%s3637_s2 + $0x28] sm:$0xff]  ;;  %v239_v11 = vld [vmem:[%s3637_s2 + $0x30] sm:$0xff] }
   0xa   :  { %271 = vperm.xlu2 %2189, %v237_v6   ;;  %v2146_v12 = vld [vmem:[%s3635_s0 + $0x18] sm:$0xff]  ;;  %v2145_v14 = vld [vmem:[%s3635_s0 + $0x10] sm:$0xff]  ;;  %v241_v15 = vld [vmem:[%s3637_s2 + $0x40] sm:$0xff] }
   0xb   :  { %v240_v13 = vld [vmem:[%s3637_s2 + $0x38] sm:$0xff]  ;;  %v242_v16 = vld [vmem:[%s3637_s2 + $0x48] sm:$0xff]  ;;  %v243_v18 = vld [vmem:[%s3637_s2 + $0x50] sm:$0xff] }
   0xc   :  { %v2144_v17 = vld [vmem:[%s3635_s0 + $0x8] sm:$0xff]  ;;  %v2143_v19 = vld [vmem:[%s3635_s0] sm:$0xff]  ;;  %v244_v20 = vld [vmem:[%s3637_s2 + $0x58] sm:$0xff] }
   0xd   :  { %185 = vmatpush.bf16.msra.mxu0 %v2149_v3  ;;  %v2135_v21 = vld [vmem:[%s3636_s1] sm:$0xff]  ;;  %v246_v23 = vld [vmem:[%s3637_s2 + $0x68] sm:$0xff]  ;;  %v247_v24 = vld [vmem:[%s3637_s2 + $0x70] sm:$0xff] }
   0xe   :  { %v245_v22 = vld [vmem:[%s3637_s2 + $0x60] sm:$0xff]  ;;  %v248_v25 = vld [vmem:[%s3637_s2 + $0x78] sm:$0xff]  ;;  %v1413_v26 = vld [vmem:[%s3638_s3 + $0x8] sm:$0xff]  ;;  %s1945_s2 = sshll.u32 %s3644_s9, 4  ;;  %s1946_s2 = int_to_ptr.hbm [resolvable:$true] %s1945_s2 }
   0xf   :  { %v1412_v27 = vld [vmem:[%s3638_s3] sm:$0xff]  ;;  %vm1484_vm1 = vcmp.gt.f32.partialorder %v1413_v26, 0.0  ;;  %v2136_v29 = vld [vmem:[%s3636_s1 + $0x8] sm:$0xff]  ;;  %v2444_v31 = vld [vmem:[%s3638_s3 + $0x18] sm:$0xff] }
  0x10   :  { %256 = vperm.xlu0 %2187, %v234_v5   ;;  %vm1483_vm0 = vcmp.gt.f32.partialorder %v1412_v27, 0.0  ;;  %v2438_v30 = vsel %vm1484_vm1, 1, %v3645_v0  ;;  %v1414_v32 = vld [vmem:[%s3638_s3 + $0x10] sm:$0xff]  ;;  %vm1486_vm3 = vcmp.gt.f32.partialorder %v2444_v31, 0.0  ;;  %v2461_v35 = vld [vmem:[%s3638_s3 + $0x28] sm:$0xff]  ;;  %v1416_v36 = vld [vmem:[%s3638_s3 + $0x20] sm:$0xff] }
  0x11   :  { %186 = vmatpush.bf16.msra.mxu0 %v2148_v7  ;;  %266 = vperm.xlu1 %2188, %v236_v8   ;;  %v2432_v28 = vsel %vm1483_vm0, 1, %v3645_v0  ;;  %vm1485_vm2 = vcmp.gt.f32.partialorder %v1414_v32, 0.0  ;;  %v2455_v34 = vsel %vm1486_vm3, 1, %v3645_v0  ;;  %vm1487_vm4 = vcmp.gt.f32.partialorder %v1416_v36, 0.0  ;;  %v2137_v38 = vld [vmem:[%s3636_s1 + $0x10] sm:$0xff]  ;;  %v2481_v40 = vld [vmem:[%s3638_s3 + $0x38] sm:$0xff] }
  0x12   :  { %276 = vperm.xlu2 %2189, %v238_v10   ;;  %v2452_v33 = vsel %vm1485_vm2, 1, %v3645_v0  ;;  %vm1488_vm5 = vcmp.gt.f32.partialorder %v2461_v35, 0.0  ;;  %v2469_v37 = vsel %vm1487_vm4, 1, %v3645_v0  ;;  %v2487_v41 = vld [vmem:[%s3638_s3 + $0x30] sm:$0xff]  ;;  %vm1490_vm7 = vcmp.gt.f32.partialorder %v2481_v40, 0.0  ;;  %v2501_v44 = vld [vmem:[%s3638_s3 + $0x40] sm:$0xff] }
  0x13   :  { %v2475_v39 = vsel %vm1488_vm5, 1, %v3645_v0  ;;  %vm1489_vm6 = vcmp.gt.f32.partialorder %v2487_v41, 0.0  ;;  %v2495_v43 = vsel %vm1490_vm7, 1, %v3645_v0  ;;  %vm1491_vm8 = vcmp.gt.f32.partialorder %v2501_v44, 0.0  ;;  %v2138_v45 = vld [vmem:[%s3636_s1 + $0x18] sm:$0xff]  ;;  %v2524_v49 = vld [vmem:[%s3638_s3 + $0x60] sm:$0xff] }
  0x14   :  { %v2492_v42 = vsel %vm1489_vm6, 1, %v3645_v0  ;;  %v2509_v46 = vsel %vm1491_vm8, 1, %v3645_v0  ;;  %v2514_v47 = vld [vmem:[%s3638_s3 + $0x58] sm:$0xff]  ;;  %vm1495_vm10 = vcmp.gt.f32.partialorder %v2524_v49, 0.0  ;;  %v2139_v50 = vld [vmem:[%s3636_s1 + $0x20] sm:$0xff]  ;;  %v2173_v54 = vld [vmem:[%s3640_s5 + $0x70] sm:$0xff] }
  0x15   :  { %187 = vmatpush.bf16.msra.mxu0 %v2147_v9  ;;  %vm1494_vm9 = vcmp.gt.f32.partialorder %v2514_v47, 0.0  ;;  %v2532_v51 = vsel %vm1495_vm10, 1, %v3645_v0  ;;  %v2537_v52 = vld [vmem:[%s3638_s3 + $0x78] sm:$0xff]  ;;  %v2172_v56 = vld [vmem:[%s3640_s5 + $0x68] sm:$0xff]  ;;  %v2171_v58 = vld [vmem:[%s3640_s5 + $0x60] sm:$0xff] }
  0x16   :  { %v2519_v48 = vsel %vm1494_vm9, 1, %v3645_v0  ;;  %v2174_v53 = vld [vmem:[%s3640_s5 + $0x78] sm:$0xff]  ;;  %vm1498_vm11 = vcmp.gt.f32.partialorder %v2537_v52, 0.0  ;;  %v2140_v59 = vld [vmem:[%s3636_s1 + $0x28] sm:$0xff]  ;;  %v2165_v60 = vld [vmem:[%s3640_s5 + $0x30] sm:$0xff] }
  0x17   :  { %659 = vmatpush.bf16.msra.mxu2 %v2174_v53  ;;  %v2548_v55 = vsel %vm1498_vm11, 1, %v3645_v0  ;;  %v2166_v57 = vld [vmem:[%s3640_s5 + $0x38] sm:$0xff]  ;;  %v2164_v62 = vld [vmem:[%s3640_s5 + $0x28] sm:$0xff]  ;;  %v2169_v63 = vld [vmem:[%s3640_s5 + $0x50] sm:$0xff] }
  0x18   :  { %281 = vperm.xlu0 %2187, %v239_v11   ;;  %610 = vmatpush.bf16.msra.mxu1 %v2166_v57  ;;  %v2170_v61 = vld [vmem:[%s3640_s5 + $0x58] sm:$0xff]  ;;  %v2163_v1 = vld [vmem:[%s3640_s5 + $0x20] sm:$0xff]  ;;  %v2168_v2 = vld [vmem:[%s3640_s5 + $0x48] sm:$0xff] }
  0x19   :  { %188 = vmatpush.bf16.msra.mxu0 %v2146_v12  ;;  %286 = vperm.xlu1 %2188, %v240_v13   ;;  %v2141_v3 = vld [vmem:[%s3636_s1 + $0x30] sm:$0xff]  ;;  %v2162_v4 = vld [vmem:[%s3640_s5 + $0x18] sm:$0xff]  ;;  %v2167_v5 = vld [vmem:[%s3640_s5 + $0x40] sm:$0xff] }
  0x1a   :  { %291 = vperm.xlu2 %2189, %v241_v15   ;;  %v2151_v6 = vld [vmem:[%s3635_s0] sm:$0xff]  ;;  %v2161_v7 = vld [vmem:[%s3640_s5 + $0x10] sm:$0xff]  ;;  %v2160_v8 = vld [vmem:[%s3640_s5 + $0x8] sm:$0xff] }
  0x1b   :  { %660 = vmatpush.bf16.msra.mxu2 %v2173_v54  ;;  %v2159_v9 = vld [vmem:[%s3640_s5] sm:$0xff]  ;;  %v2142_v10 = vld [vmem:[%s3636_s1 + $0x38] sm:$0xff]  ;;  %v2152_v11 = vld [vmem:[%s3635_s0 + $0x8] sm:$0xff]  ;;  %s1943_s5 = sshll.u32 %s2293_s25, 4  ;;  %s1944_s5 = int_to_ptr.vmem [resolvable:$true] %s1943_s5 }
  0x1c   :  { %611 = vmatpush.bf16.msra.mxu1 %v2165_v60 }
  0x1d   :  { %189 = vmatpush.bf16.msra.mxu0 %v2145_v14  ;;  %v2153_v14 = vld [vmem:[%s3635_s0 + $0x10] sm:$0xff] }
  0x1f   :  { %661 = vmatpush.bf16.msra.mxu2 %v2172_v56 }
  0x20   :  { %296 = vperm.xlu0 %2187, %v242_v16   ;;  %612 = vmatpush.bf16.msra.mxu1 %v2164_v62 }
  0x21   :  { %190 = vmatpush.bf16.msra.mxu0 %v2144_v17  ;;  %301 = vperm.xlu1 %2188, %v243_v18  }
  0x22   :  { %306 = vperm.xlu2 %2189, %v244_v20  }
  0x23   :  { %662 = vmatpush.bf16.msra.mxu2 %v2171_v58 }
  0x24   :  { %613 = vmatpush.bf16.msra.mxu1 %v2163_v1  ;;  %v2156_v1 = vld [vmem:[%s3635_s0 + $0x28] sm:$0xff] }
  0x25   :  { %191 = vmatpush.bf16.msra.mxu0 %v2143_v19 }
  0x27   :  { %663 = vmatpush.bf16.msra.mxu2 %v2170_v61 }
  0x28   :  { %311 = vperm.xlu0 %2187, %v245_v22   ;;  %192 = vmatmul.bf16.vlgmr.msra.gmra.mxu0 %v2135_v21 }
  0x29   :  { %316 = vperm.xlu1 %2188, %v246_v23   ;;  %614 = vmatpush.bf16.msra.mxu1 %v2162_v4 }
  0x2a   :  { %321 = vperm.xlu2 %2189, %v247_v24  }
  0x2b   :  { %664 = vmatpush.bf16.msra.mxu2 %v2169_v63 }
  0x2d   :  { %615 = vmatpush.bf16.msra.mxu1 %v2161_v7 }
  0x2f   :  { %665 = vmatpush.bf16.msra.mxu2 %v2168_v2 }
  0x30   :  { %326 = vperm.xlu0 %2187, %v248_v25  }
  0x31   :  { %616 = vmatpush.bf16.msra.mxu1 %v2160_v8  ;;  %v2289_v8 = vmov 1  }
  0x32   :  { %1516 = vperm.xlu2 %2189, %v2432_v28  }
  0x33   :  { %666 = vmatpush.bf16.msra.mxu2 %v2167_v5 }
  0x35   :  { %617 = vmatpush.bf16.msra.mxu1 %v2159_v9 }
  0x36   :  { %667 = vmatmul.bf16.vlgmr.msra.gmra.mxu2 %v2151_v6 }
  0x38   :  { %1519 = vperm.xlu0 %2187, %v2438_v30   ;;  %197 = vmatmul.bf16.gmra.mxu0 %v2136_v29 }
  0x3a   :  { %1522 = vperm.xlu2 %2189, %v2452_v33  }
  0x40   :  { %1525 = vperm.xlu0 %2187, %v2455_v34  }
  0x42   :  { %1528 = vperm.xlu2 %2189, %v2469_v37  }
  0x46   :  { %672 = vmatmul.bf16.gmra.mxu2 %v2152_v11 }
  0x48   :  { %1531 = vperm.xlu0 %2187, %v2475_v39   ;;  %202 = vmatmul.bf16.gmra.mxu0 %v2137_v38 }
  0x4a   :  { %1534 = vperm.xlu2 %2189, %v2492_v42  }
  0x50   :  { %1537 = vperm.xlu0 %2187, %v2495_v43  }
  0x52   :  { %2190 = vset.pattern.permute.xlu2 %v2289_v8 }
  0x53   :  { %1654 = vperm.xlu2 %2190, %v2432_v28  }
  0x56   :  { %677 = vmatmul.bf16.gmra.mxu2 %v2153_v14  ;;  %v2157_v14 = vld [vmem:[%s3635_s0 + $0x30] sm:$0xff] }
  0x58   :  { %1540 = vperm.xlu0 %2187, %v2509_v46   ;;  %207 = vmatmul.bf16.gmra.mxu0 %v2138_v45 }
  0x5b   :  { %1660 = vperm.xlu2 %2190, %v2452_v33  }
  0x5e   :  { %1429 = vxpose.xlu1.b32.start [1/16] (narrow) %v1412_v27, 8 }
  0x60   :  { %1549 = vperm.xlu0 %2187, %v2519_v48  }
  0x63   :  { %1663 = vperm.xlu2 %2190, %v2455_v34  }
  0x66   :  { %1430 = vxpose.xlu1.b32.cont [2/16] (narrow) %v1413_v26, 8  ;;  %v2154_v26 = vld [vmem:[%s3635_s0 + $0x18] sm:$0xff] }
  0x67   :  { %682 = vmatmul.bf16.gmra.mxu2 %v2154_v26 }
  0x68   :  { %1552 = vperm.xlu0 %2187, %v2532_v51   ;;  %212 = vmatmul.bf16.gmra.mxu0 %v2139_v50  ;;  %v2155_v50 = vld [vmem:[%s3635_s0 + $0x20] sm:$0xff] }
  0x6b   :  { %1669 = vperm.xlu2 %2190, %v2475_v39  }
  0x6e   :  { %1431 = vxpose.xlu1.b32.cont [3/16] (narrow) %v1414_v32, 8 }
  0x70   :  { %1561 = vperm.xlu0 %2187, %v2548_v55  }
  0x73   :  { %1675 = vperm.xlu2 %2190, %v2495_v43   ;;  %v1421_v43 = vld [vmem:[%s3638_s3 + $0x48] sm:$0xff] }
  0x74   :  { %vm1492_vm12 = vcmp.gt.f32.partialorder %v1421_v43, 0.0 }
  0x76   :  { %1432 = vxpose.xlu1.b32.cont [4/16] (narrow) %v2444_v31, 8 }
  0x77   :  { %687 = vmatmul.bf16.gmra.mxu2 %v2155_v50 }
  0x78   :  { %217 = vmatmul.bf16.gmra.mxu0 %v2140_v59  ;;  %2194 = vset.pattern.permute.xlu0 %v2289_v8 }
  0x79   :  { %1657 = vperm.xlu0 %2194, %v2438_v30  }
  0x7a   :  { %v252_v12 = vpop.permute.xlu0 %251 }
  0x7b   :  { %v262_v23 = vpop.permute.xlu1 %261  ;;  %2191 = vset.pattern.permute.xlu2 %v3645_v0 }
  0x7e   :  { %1433 = vxpose.xlu1.b32.cont [5/16] (narrow) %v1416_v36, 8 }
  0x81   :  { %1666 = vperm.xlu0 %2194, %v2469_v37  }
  0x82   :  { %v257_v16 = vpop.permute.xlu0 %256 }
  0x83   :  { %v267_v29 = vpop.permute.xlu1 %266 }
  0x86   :  { %1434 = vxpose.xlu1.b32.cont [6/16] (narrow) %v2461_v35, 8 }
  0x87   :  { %692 = vmatmul.bf16.gmra.mxu2 %v2156_v1 }
  0x88   :  { %222 = vmatmul.bf16.gmra.mxu0 %v2141_v3 }
  0x89   :  { %1672 = vperm.xlu0 %2194, %v2492_v42  }
  0x8a   :  { %v282_v2 = vpop.permute.xlu0 %281 }
  0x8b   :  { %v287_v4 = vpop.permute.xlu1 %286 }
  0x8e   :  { %1435 = vxpose.xlu1.b32.cont [7/16] (narrow) %v2487_v41, 8  ;;  %v272_v41 = vpop.permute.xlu2 %271 }
  0x92   :  { %v297_v30 = vpop.permute.xlu0 %296 }
  0x96   :  { %1436 = vxpose.xlu1.b32.cont [8/16] (narrow) %v2481_v40, 8  ;;  %v277_v54 = vpop.permute.xlu2 %276 }
  0x97   :  { %697 = vmatmul.bf16.gmra.mxu2 %v2157_v14 }
  0x98   :  { %227 = vmatmul.bf16.gmra.mxu0 %v2142_v10 }
  0x9a   :  { %v312_v39 = vpop.permute.xlu0 %311 }
  0x9e   :  { %1437 = vxpose.xlu1.b32.cont [9/16] (narrow) %v2501_v44, 8 }
  0xa5   :  { %v193_v13 = vpop.f32.mrf.mxu0 }
  0xa6   :  { %v329_v15 = vmul.f32 %v252_v12, %v193_v13  ;;  %1438 = vxpose.xlu1.b32.cont [10/16] (narrow) %v1421_v43, 8 }
  0xa8   :  { %v366_v18 = vpack.c.bf16 %v329_v15, %v329_v15  ;;  %v292_v15 = vpop.permute.xlu2 %291 }
  0xaa   :  { %v398_v21 = vunpack.c.l.b16 %v366_v18 }
  0xad   :  { %v195_v17 = vpop.f32.mrf.mxu0 }
  0xae   :  { %v330_v19 = vmul.f32 %v257_v16, %v195_v17 }
  0xb0   :  { %v367_v20 = vpack.c.bf16 %v330_v19, %v330_v19 }
  0xb2   :  { %v399_v22 = vunpack.c.l.b16 %v367_v20 }
  0xb4   :  { %v414_v24 = vpack.c.b16 %v399_v22, %v398_v21  ;;  %v2158_v22 = vld [vmem:[%s3635_s0 + $0x38] sm:$0xff] }
  0xb5   :  { %v198_v25 = vpop.f32.mrf.mxu0  ;;  %702 = vmatmul.bf16.gmra.mxu2 %v2158_v22 }
  0xb6   :  { %618 = vmatmul.bf16.vlgmr.msra.gmra.mxu1 %v414_v24  ;;  %v331_v27 = vmul.f32 %v262_v23, %v198_v25  ;;  %v302_v23 = vpop.permute.xlu1 %301  ;;  %v307_v25 = vpop.permute.xlu2 %306 }
  0xb8   :  { %v368_v32 = vpack.c.bf16 %v331_v27, %v331_v27 }
  0xba   :  { %v400_v38 = vunpack.c.l.b16 %v368_v32 }
  0xbd   :  { %v200_v31 = vpop.f32.mrf.mxu0 }
  0xbe   :  { %v332_v35 = vmul.f32 %v267_v29, %v200_v31 }
  0xc0   :  { %v369_v36 = vpack.c.bf16 %v332_v35, %v332_v35 }
  0xc2   :  { %v401_v40 = vunpack.c.l.b16 %v369_v36 }
  0xc4   :  { %v415_v44 = vpack.c.b16 %v401_v40, %v400_v38  ;;  %v317_v38 = vpop.permute.xlu1 %316 }
  0xc5   :  { %v203_v45 = vpop.f32.mrf.mxu0 }
  0xc6   :  { %623 = vmatmul.bf16.gmra.mxu1 %v415_v44  ;;  %v333_v53 = vmul.f32 %v272_v41, %v203_v45 }
  0xc8   :  { %v370_v57 = vpack.c.bf16 %v333_v53, %v333_v53 }
  0xca   :  { %v402_v60 = vunpack.c.l.b16 %v370_v57 }
  0xcd   :  { %v205_v56 = vpop.f32.mrf.mxu0 }
  0xce   :  { %v334_v58 = vmul.f32 %v277_v54, %v205_v56  ;;  %v1508_v56 = vsel %vm1492_vm12, 1, %v3645_v0 }
  0xcf   :  { %1543 = vperm.xlu2 %2191, %v1508_v56   ;;  %1681 = vperm.xlu0 %2194, %v1508_v56  }
  0xd0   :  { %v371_v59 = vpack.c.bf16 %v334_v58, %v334_v58  ;;  %v322_v58 = vpop.permute.xlu2 %321 }
  0xd2   :  { %v403_v61 = vunpack.c.l.b16 %v371_v59 }
  0xd4   :  { %v416_v62 = vpack.c.b16 %v403_v61, %v402_v60  ;;  %v1422_v60 = vld [vmem:[%s3638_s3 + $0x50] sm:$0xff]  ;;  %v327_v61 = vpop.permute.xlu0 %326 }
  0xd5   :  { %v208_v63 = vpop.f32.mrf.mxu0  ;;  %vm1493_vm13 = vcmp.gt.f32.partialorder %v1422_v60, 0.0  ;;  %1439 = vxpose.xlu1.b32.cont [11/16] (narrow) %v1422_v60, 8 }
  0xd6   :  { %628 = vmatmul.bf16.gmra.mxu1 %v416_v62  ;;  %v335_v3 = vmul.f32 %v282_v2, %v208_v63  ;;  %v1509_v63 = vsel %vm1493_vm13, 1, %v3645_v0 }
  0xd7   :  { %1546 = vperm.xlu2 %2191, %v1509_v63  }
  0xd8   :  { %v372_v6 = vpack.c.bf16 %v335_v3, %v335_v3 }
  0xda   :  { %v404_v10 = vunpack.c.l.b16 %v372_v6 }
  0xdd   :  { %v210_v5 = vpop.f32.mrf.mxu0  ;;  %1440 = vxpose.xlu1.b32.cont [12/16] (narrow) %v2514_v47, 8 }
  0xde   :  { %v336_v7 = vmul.f32 %v287_v4, %v210_v5 }
  0xdf   :  { %2192 = vset.pattern.permute.xlu2 %v2289_v8 }
  0xe0   :  { %v373_v9 = vpack.c.bf16 %v336_v7, %v336_v7  ;;  %1678 = vperm.xlu2 %2192, %v2509_v46   ;;  %v668_v7 = vpop.f32.mrf.mxu2  ;;  %v2666_v46 = vpop.permute.xlu0 %1519 }
  0xe2   :  { %v405_v11 = vunpack.c.l.b16 %v373_v9  ;;  %v2657_v9 = vld [vmem:[%s3641_s6] ss:$0 sm:$0xff] }
  0xe4   :  { %v417_v12 = vpack.c.b16 %v405_v11, %v404_v10 }
  0xe5   :  { %v213_v13 = vpop.f32.mrf.mxu0  ;;  %1441 = vxpose.xlu1.b32.cont [13/16] (narrow) %v2524_v49, 8 }
  0xe6   :  { %633 = vmatmul.bf16.gmra.mxu1 %v417_v12  ;;  %v337_v16 = vmul.f32 %v292_v15, %v213_v13 }
  0xe8   :  { %v374_v28 = vpack.c.bf16 %v337_v16, %v337_v16  ;;  %1684 = vperm.xlu2 %2192, %v1509_v63   ;;  %v670_v47 = vpop.f32.mrf.mxu2 }
  0xea   :  { %v406_v20 = vunpack.c.l.b16 %v374_v28 }
  0xed   :  { %v215_v17 = vpop.f32.mrf.mxu0 }
  0xee   :  { %v338_v18 = vmul.f32 %v297_v30, %v215_v17 }
  0xf0   :  { %v375_v19 = vpack.c.bf16 %v338_v18, %v338_v18  ;;  %1687 = vperm.xlu2 %2192, %v2519_v48  }
  0xf2   :  { %v407_v33 = vunpack.c.l.b16 %v375_v19 }
  0xf4   :  { %v418_v21 = vpack.c.b16 %v407_v33, %v406_v20  ;;  %v673_v20 = vpop.f32.mrf.mxu2 }
  0xf5   :  { %v218_v37 = vpop.f32.mrf.mxu0 }
  0xf6   :  { %638 = vmatmul.bf16.gmra.mxu1 %v418_v21  ;;  %v339_v24 = vmul.f32 %v302_v23, %v218_v37  ;;  %v2685_v23 = vpop.permute.xlu0 %1525 }
  0xf8   :  { %v376_v34 = vpack.c.bf16 %v339_v24, %v339_v24  ;;  %2193 = vset.pattern.permute.xlu2 %v3645_v0 }
  0xfa   :  { %v408_v29 = vunpack.c.l.b16 %v376_v34 }
  0xfd   :  { %v220_v26 = vpop.f32.mrf.mxu0 }
  0xfe   :  { %v340_v27 = vmul.f32 %v307_v25, %v220_v26 }
 0x100   :  { %v377_v42 = vpack.c.bf16 %v340_v27, %v340_v27 }
 0x102   :  { %v409_v31 = vunpack.c.l.b16 %v377_v42 }
 0x104   :  { %v419_v32 = vpack.c.b16 %v409_v31, %v408_v29 }
 0x105   :  { %v223_v35 = vpop.f32.mrf.mxu0 }
 0x106   :  { %643 = vmatmul.bf16.gmra.mxu1 %v419_v32  ;;  %v341_v36 = vmul.f32 %v312_v39, %v223_v35 }
 0x108   :  { %v378_v41 = vpack.c.bf16 %v341_v36, %v341_v36 }
 0x10a   :  { %v410_v50 = vunpack.c.l.b16 %v378_v41  ;;  %v1425_v41 = vld [vmem:[%s3638_s3 + $0x68] sm:$0xff] }
 0x10b   :  { %vm1496_vm14 = vcmp.gt.f32.partialorder %v1425_v41, 0.0  ;;  %1442 = vxpose.xlu1.b32.cont [14/16] (narrow) %v1425_v41, 8 }
 0x10d   :  { %v225_v40 = vpop.f32.mrf.mxu0 }
 0x10e   :  { %v342_v44 = vmul.f32 %v317_v38, %v225_v40  ;;  %v2699_v38 = vpop.permute.xlu2 %1516 }
 0x110   :  { %v379_v45 = vpack.c.bf16 %v342_v44, %v342_v44 }
 0x112   :  { %v411_v53 = vunpack.c.l.b16 %v379_v45 }
 0x114   :  { %v420_v54 = vpack.c.b16 %v411_v53, %v410_v50  ;;  %v675_v50 = vpop.f32.mrf.mxu2 }
 0x115   :  { %v228_v57 = vpop.f32.mrf.mxu0 }
 0x116   :  { %648 = vmatmul.bf16.gmra.mxu1 %v420_v54  ;;  %v343_v59 = vmul.f32 %v322_v58, %v228_v57  ;;  %v1512_v57 = vsel %vm1496_vm14, 1, %v3645_v0 }
 0x117   :  { %1555 = vperm.xlu2 %2193, %v1512_v57   ;;  %1693 = vperm.xlu0 %2194, %v1512_v57  }
 0x118   :  { %v380_v1 = vpack.c.bf16 %v343_v59, %v343_v59 }
 0x11a   :  { %v412_v4 = vunpack.c.l.b16 %v380_v1 }
 0x11d   :  { %v230_v62 = vpop.f32.mrf.mxu0 }
 0x11e   :  { %v344_v2 = vmul.f32 %v327_v61, %v230_v62  ;;  %v2712_v61 = vpop.permute.xlu0 %1531 }
 0x11f   :  { %2196 = vset.pattern.permute.xlu0 %v3645_v0 }
 0x120   :  { %v381_v3 = vpack.c.bf16 %v344_v2, %v344_v2 }
 0x122   :  { %v413_v5 = vunpack.c.l.b16 %v381_v3 }
 0x124   :  { %v421_v6 = vpack.c.b16 %v413_v5, %v412_v4 }
 0x126   :  { %653 = vmatmul.bf16.gmra.mxu1 %v421_v6 }
 0x133   :  { %v619_v10 = vpop.f32.mrf.mxu1 }
 0x134   :  { %v620_v11 = vadd.f32 %v2657_v9, %v619_v10 }
 0x136   :  { %v2660_v12 = vadd.f32 %v668_v7, %v620_v11 }
 0x138   :  { %v2664_v13 = vmul.f32 0.70710677, %v2660_v12 }
 0x13a   :  { %v740_v49 = vmul.f32 %v2664_v13, %v2664_v13 }
 0x13b   :  { %v621_v14 = vpop.f32.mrf.mxu1 }
 0x13c   :  { %v2670_v15 = vmin.f32 %v740_v49, 16.0  ;;  %v622_v16 = vadd.f32 %v2657_v9, %v621_v14 }
 0x13e   :  { %v742_v30 = vmul.f32 2.1237322e-06, %v2670_v15  ;;  %v753_v17 = vmul.f32 3.8918573e-05, %v2670_v15  ;;  %v2675_v28 = vadd.f32 %v670_v47, %v622_v16  ;;  %v2730_v16 = vpop.permute.xlu2 %1522 }
 0x140   :  { %v743_v48 = vadd.f32 0.00028619796, %v742_v30  ;;  %v754_v18 = vadd.f32 0.001143296, %v753_v17  ;;  %v2679_v19 = vmul.f32 0.70710677, %v2675_v28 }
 0x142   :  { %v744_v33 = vmul.f32 %v743_v48, %v2670_v15  ;;  %v755_v21 = vmul.f32 %v754_v18, %v2670_v15  ;;  %v780_v37 = vmul.f32 %v2679_v19, %v2679_v19 }
 0x143   :  { %v624_v22 = vpop.f32.mrf.mxu1 }
 0x144   :  { %v756_v24 = vadd.f32 0.014752088, %v755_v21  ;;  %v625_v25 = vadd.f32 %v2657_v9, %v624_v22  ;;  %v745_v26 = vadd.f32 0.0036580483, %v744_v33  ;;  %v2688_v34 = vmin.f32 %v780_v37, 16.0  ;;  %v678_v21 = vpop.f32.mrf.mxu2 }
 0x146   :  { %v757_v27 = vmul.f32 %v756_v24, %v2670_v15  ;;  %v2691_v42 = vadd.f32 %v673_v20, %v625_v25  ;;  %v793_v29 = vmul.f32 3.8918573e-05, %v2688_v34  ;;  %v782_v32 = vmul.f32 2.1237322e-06, %v2688_v34 }
 0x147   :  { %v746_v35 = vmul.f32 %v745_v26, %v2670_v15 }
 0x148   :  { %v758_v31 = vadd.f32 0.112945676, %v757_v27  ;;  %v794_v39 = vadd.f32 0.001143296, %v793_v29  ;;  %v2697_v36 = vmul.f32 0.70710677, %v2691_v42  ;;  %v2742_v29 = vpop.permute.xlu0 %1537 }
 0x149   :  { %v783_v54 = vadd.f32 0.00028619796, %v782_v32  ;;  %v747_v58 = vadd.f32 0.05243302, %v746_v35 }
 0x14a   :  { %v759_v40 = vmul.f32 %v758_v31, %v2670_v15  ;;  %v795_v44 = vmul.f32 %v794_v39, %v2688_v34  ;;  %v820_v45 = vmul.f32 %v2697_v36, %v2697_v36 }
 0x14b   :  { %v626_v53 = vpop.f32.mrf.mxu1  ;;  %v784_v4 = vmul.f32 %v783_v54, %v2688_v34  ;;  %v748_v7 = vmul.f32 %v747_v58, %v2670_v15 }
 0x14c   :  { %v760_v43 = vadd.f32 0.4994258, %v759_v40  ;;  %v627_v56 = vadd.f32 %v2657_v9, %v626_v53  ;;  %v796_v59 = vadd.f32 0.014752088, %v795_v44  ;;  %v2710_v60 = vmin.f32 %v820_v45, 16.0 }
 0x14d   :  { %v785_v30 = vadd.f32 0.0036580483, %v784_v4  ;;  %v749_v20 = vadd.f32 0.18741608, %v748_v7 }
 0x14e   :  { %v761_v62 = vmul.f32 %v760_v43, %v2670_v15  ;;  %v2715_v63 = vadd.f32 %v675_v50, %v627_v56  ;;  %v797_v1 = vmul.f32 %v796_v59, %v2688_v34  ;;  %v822_v2 = vmul.f32 2.1237322e-06, %v2710_v60  ;;  %v2756_v43 = vld [vmem:[%s3638_s3 + $0x70] sm:$0xff] }
 0x14f   :  { %v833_v5 = vmul.f32 3.8918573e-05, %v2710_v60  ;;  %v786_v31 = vmul.f32 %v785_v30, %v2688_v34  ;;  %v750_v44 = vmul.f32 %v749_v20, %v2670_v15  ;;  %1443 = vxpose.xlu1.b32.cont [15/16] (narrow) %v2756_v43, 8  ;;  %vm1497_vm3 = vcmp.gt.f32.partialorder %v2756_v43, 0.0 }
 0x150   :  { %v2719_v3 = vadd.f32 1.0, %v761_v62  ;;  %v2724_v6 = vmul.f32 0.70710677, %v2715_v63  ;;  %v798_v10 = vadd.f32 0.112945676, %v797_v1 }
 0x151   :  { %v823_v11 = vadd.f32 0.00028619796, %v822_v2  ;;  %v834_v17 = vadd.f32 0.001143296, %v833_v5  ;;  %v787_v58 = vadd.f32 0.05243302, %v786_v31  ;;  %v2763_v2 = vpop.permute.xlu2 %1528 }
 0x152   :  { %2200 = vrcp.f32 %v2719_v3  ;;  %v799_v47 = vmul.f32 %v798_v10, %v2688_v34  ;;  %v860_v48 = vmul.f32 %v2724_v6, %v2724_v6  ;;  %v774_v57 = vand.u32 2147483648, %v2719_v3 }
 0x153   :  { %v824_v49 = vmul.f32 %v823_v11, %v2710_v60  ;;  %v629_v14 = vpop.f32.mrf.mxu1  ;;  %v835_v22 = vmul.f32 %v834_v17, %v2710_v60  ;;  %v772_v62 = vand.u32 2147483647, %v2719_v3  ;;  %v751_v4 = vadd.f32 1.1283791, %v750_v44 }
 0x154   :  { %v630_v18 = vadd.f32 %v2657_v9, %v629_v14  ;;  %v800_v33 = vadd.f32 0.4994258, %v799_v47  ;;  %v2737_v24 = vmin.f32 %v860_v48, 16.0  ;;  %vm768_vm0 = vweird.f32 %v2719_v3 }
 0x155   :  { %v825_v37 = vadd.f32 0.0036580483, %v824_v49  ;;  %v836_v35 = vadd.f32 0.014752088, %v835_v22  ;;  %v775_v14 = vor.u32 1.1754944e-38, %v774_v57  ;;  %v788_v30 = vmul.f32 %v787_v58, %v2688_v34 }
 0x156   :  { %v2739_v25 = vadd.f32 %v678_v21, %v630_v18  ;;  %v801_v26 = vmul.f32 %v800_v33, %v2688_v34  ;;  %v873_v39 = vmul.f32 3.8918573e-05, %v2737_v24  ;;  %v862_v50 = vmul.f32 2.1237322e-06, %v2737_v24  ;;  %v2777_v21 = vpop.permute.xlu0 %1540 }
 0x157   :  { %v826_v32 = vmul.f32 %v825_v37, %v2710_v60  ;;  %v837_v45 = vmul.f32 %v836_v35, %v2710_v60  ;;  %vm773_vm2 = vcmp.eq.f32.partialorder %v772_v62, 8.507059e+37  ;;  %v752_v37 = vmul.f32 %v751_v4, %v2664_v13  ;;  %1444 = vxpose.xlu1.b32.end [16/16] (narrow) %v2537_v52, 8 }
 0x158   :  { %v2201_v27 = vpop.eup %2200  ;;  %v2748_v41 = vadd.f32 1.0, %v801_v26  ;;  %v874_v53 = vadd.f32 0.001143296, %v873_v39  ;;  %v863_v7 = vadd.f32 0.00028619796, %v862_v50 }
 0x159   :  { %v764_v40 = vmul.f32 %v2201_v27, %v2719_v3  ;;  %v827_v56 = vadd.f32 0.05243302, %v826_v32  ;;  %v838_v15 = vadd.f32 0.112945676, %v837_v45  ;;  %vm769_vm15 = vweird.f32 %v2201_v27  ;;  %v2796_v58 = vpop.permute.xlu2 %1534 }
 0x15a   :  { %2202 = vrcp.f32 %v2748_v41  ;;  %v875_v1 = vmul.f32 %v874_v53, %v2737_v24  ;;  %v2769_v49 = vmul.f32 0.70710677, %v2739_v25  ;;  %vm770_vm1 = vmor %vm768_vm0, %vm769_vm15  ;;  %v864_v26 = vmul.f32 %v863_v7, %v2737_v24 }
 0x15b   :  { %v765_v54 = vsub.f32 1.0, %v764_v40  ;;  %v839_v5 = vmul.f32 %v838_v15, %v2710_v60  ;;  %v828_v11 = vmul.f32 %v827_v56, %v2710_v60  ;;  %v631_v48 = vpop.f32.mrf.mxu1  ;;  %v789_v45 = vadd.f32 0.18741608, %v788_v30 }
 0x15c   :  { %v876_v47 = vadd.f32 0.014752088, %v875_v1  ;;  %v900_v33 = vmul.f32 %v2769_v49, %v2769_v49  ;;  %v632_v39 = vadd.f32 %v2657_v9, %v631_v48  ;;  %v865_v57 = vadd.f32 0.0036580483, %v864_v26 }
 0x15d   :  { %v766_v59 = vmul.f32 %v2201_v27, %v765_v54  ;;  %v840_v17 = vadd.f32 0.4994258, %v839_v5  ;;  %v829_v31 = vadd.f32 0.18741608, %v828_v11  ;;  %v680_v54 = vpop.f32.mrf.mxu2  ;;  %v708_v1 = vmul.f32 0.5, %v2660_v12 }
 0x15e   :  { %v877_v3 = vmul.f32 %v876_v47, %v2737_v24  ;;  %v2786_v44 = vmin.f32 %v900_v33, 16.0  ;;  %v2794_v52 = vadd.f32 %v680_v54, %v632_v39  ;;  %v790_v4 = vmul.f32 %v789_v45, %v2688_v34  ;;  %v2809_v12 = vpop.permute.xlu0 %1549 }
 0x15f   :  { %v767_v10 = vadd.f32 %v2201_v27, %v766_v59  ;;  %v841_v32 = vmul.f32 %v840_v17, %v2710_v60  ;;  %v830_v56 = vmul.f32 %v829_v31, %v2710_v60  ;;  %v812_v7 = vand.u32 2147483647, %v2748_v41  ;;  %3654 = vst [vmem:[#allocation11_spill] sm:$0xff] %v2809_v12 }
 0x160   :  { %v2772_v18 = vpop.eup %2202  ;;  %v878_v35 = vadd.f32 0.112945676, %v877_v3  ;;  %v913_v53 = vmul.f32 3.8918573e-05, %v2786_v44  ;;  %v2807_v17 = vmul.f32 0.70710677, %v2794_v52  ;;  %vm808_vm4 = vweird.f32 %v2748_v41 }
 0x161   :  { %v771_v20 = vsel %vm770_vm1, %v2201_v27, %v767_v10  ;;  %v804_v40 = vmul.f32 %v2772_v18, %v2748_v41  ;;  %v2788_v50 = vadd.f32 1.0, %v841_v32  ;;  %v814_v10 = vand.u32 2147483648, %v2748_v41 }
 0x162   :  { %v776_v22 = vsel %vm773_vm2, %v775_v14, %v771_v20  ;;  %v879_v13 = vmul.f32 %v878_v35, %v2737_v24  ;;  %v914_v5 = vadd.f32 0.001143296, %v913_v53  ;;  %v831_v47 = vadd.f32 1.1283791, %v830_v56  ;;  %v1655_v56 = vpop.permute.xlu2 %1654 }
 0x163   :  { %v777_v27 = vmul.f32 %v776_v22, %v752_v37  ;;  %2204 = vrcp.f32 %v2788_v50  ;;  %v805_v59 = vsub.f32 1.0, %v804_v40  ;;  %v634_v11 = vpop.f32.mrf.mxu1  ;;  %v866_v14 = vmul.f32 %v865_v57, %v2737_v24 }
 0x164   :  { %v880_v62 = vadd.f32 0.4994258, %v879_v13  ;;  %v915_v30 = vmul.f32 %v914_v5, %v2786_v44  ;;  %v2813_v20 = vmul.f32 0.5, %v2691_v42  ;;  %v940_v37 = vmul.f32 %v2807_v17, %v2807_v17 }
 0x165   :  { %v2117_v15 = vclamps-f32 %v777_v27, 1.0  ;;  %v806_v48 = vmul.f32 %v2772_v18, %v805_v59  ;;  %v635_v22 = vadd.f32 %v2657_v9, %v634_v11  ;;  %v2821_v26 = vsel %vm1497_vm3, 1, %v3645_v0  ;;  %v683_v54 = vpop.f32.mrf.mxu2 }
 0x166   :  { %v881_v60 = vmul.f32 %v880_v62, %v2737_v24  ;;  %v916_v43 = vadd.f32 0.014752088, %v915_v30  ;;  %v791_v31 = vadd.f32 1.1283791, %v790_v4  ;;  %v815_v32 = vor.u32 1.1754944e-38, %v814_v10  ;;  %1558 = vperm.xlu2 %2193, %v2821_v26  }
 0x167   :  { %v1380_v34 = vadd.f32 1.0, %v2117_v15  ;;  %vm809_vm5 = vweird.f32 %v2772_v18  ;;  %vm2827_vm6 = vcmp.eq.f32.partialorder %v812_v7, 8.507059e+37  ;;  %v832_v39 = vmul.f32 %v831_v47, %v2697_v36 }
 0x168   :  { %v2815_v3 = vadd.f32 1.0, %v881_v60  ;;  %v867_v27 = vadd.f32 0.05243302, %v866_v14  ;;  %v854_v45 = vand.u32 2147483648, %v2788_v50  ;;  %v902_v13 = vmul.f32 2.1237322e-06, %v2786_v44  ;;  %vm2851_vm9 = vmor %vm808_vm4, %vm809_vm5 }
 0x169   :  { %v2205_v33 = vpop.eup %2204  ;;  %v917_v53 = vmul.f32 %v916_v43, %v2786_v44  ;;  %v2836_v57 = vmul.f32 %v1380_v34, %v708_v1  ;;  %v807_v15 = vadd.f32 %v2772_v18, %v806_v48  ;;  %v2839_v59 = vmin.f32 %v940_v37, 16.0  ;;  %v2868_v37 = vpop.permute.xlu0 %1552 }
 0x16a   :  { %v844_v35 = vmul.f32 %v2205_v33, %v2788_v50  ;;  %2206 = vrcp.f32 %v2815_v3  ;;  %v2841_v62 = vadd.f32 %v683_v54, %v635_v22  ;;  %vm849_vm7 = vweird.f32 %v2205_v33 }
 0x16b   :  { %v852_v4 = vand.u32 2147483647, %v2788_v50  ;;  %v918_v5 = vadd.f32 0.112945676, %v917_v53  ;;  %v868_v7 = vmul.f32 %v867_v27, %v2737_v24  ;;  %v942_v10 = vmul.f32 2.1237322e-06, %v2839_v59  ;;  %v636_v27 = vpop.f32.mrf.mxu1 }
 0x16c   :  { %v845_v40 = vsub.f32 1.0, %v844_v35  ;;  %v953_v60 = vmul.f32 3.8918573e-05, %v2839_v59  ;;  %vm1701_vm8 = vcmp.eq.s32.totalorder %v1655_v56, 1  ;;  %vm848_vm10 = vweird.f32 %v2788_v50 }
 0x16d   :  { %v855_v47 = vor.u32 1.1754944e-38, %v854_v45  ;;  %v2857_v14 = vmul.f32 0.70710677, %v2841_v62  ;;  %v811_v34 = vsel %vm2851_vm9, %v2772_v18, %v807_v15  ;;  %vm850_vm11 = vmor %vm848_vm10, %vm849_vm7  ;;  %v943_v48 = vadd.f32 0.00028619796, %v942_v10 }
 0x16e   :  { %v846_v36 = vmul.f32 %v2205_v33, %v845_v40  ;;  %v954_v41 = vadd.f32 0.001143296, %v953_v60  ;;  %v2866_v43 = vsel %vm1701_vm8, %v2836_v57, 1e+30  ;;  %vm853_vm12 = vcmp.eq.f32.partialorder %v852_v4, 8.507059e+37  ;;  %2195 = vset.pattern.permute.xlu2 %v2289_v8 }
 0x16f   :  { %v919_v35 = vmul.f32 %v918_v5, %v2786_v44  ;;  %v869_v40 = vadd.f32 0.18741608, %v868_v7  ;;  %v944_v45 = vmul.f32 %v943_v48, %v2839_v59  ;;  %1690 = vperm.xlu2 %2195, %v2532_v51   ;;  %v792_v54 = vmul.f32 %v791_v31, %v2679_v19 }
 0x170   :  { %v847_v11 = vadd.f32 %v2205_v33, %v846_v36  ;;  %v2859_v30 = vpop.eup %2206  ;;  %v955_v53 = vmul.f32 %v954_v41, %v2839_v59  ;;  %v980_v5 = vmul.f32 %v2857_v14, %v2857_v14  ;;  %v2884_v8 = vsel %vm1701_vm8, %v2836_v57, -1e+30 }
 0x171   :  { %v884_v22 = vmul.f32 %v2859_v30, %v2815_v3  ;;  %v637_v7 = vadd.f32 %v2657_v9, %v636_v27  ;;  %v920_v60 = vadd.f32 0.4994258, %v919_v35  ;;  %v945_v19 = vadd.f32 0.0036580483, %v944_v45 }
 0x172   :  { %v851_v50 = vsel %vm850_vm11, %v2205_v33, %v847_v11  ;;  %v816_v33 = vsel %vm2827_vm6, %v815_v32, %v811_v34  ;;  %v956_v4 = vadd.f32 0.014752088, %v955_v53  ;;  %v870_v31 = vmul.f32 %v869_v40, %v2737_v24 }
 0x173   :  { %v856_v18 = vsel %vm853_vm12, %v855_v47, %v851_v50  ;;  %v885_v36 = vsub.f32 1.0, %v884_v22  ;;  %vm889_vm13 = vweird.f32 %v2859_v30  ;;  %v903_v32 = vadd.f32 0.00028619796, %v902_v13  ;;  %v685_v47 = vpop.f32.mrf.mxu2 }
 0x174   :  { %v857_v15 = vmul.f32 %v856_v18, %v832_v39  ;;  %v957_v42 = vmul.f32 %v956_v4, %v2839_v59  ;;  %v817_v39 = vmul.f32 %v816_v33, %v792_v54  ;;  %v894_v11 = vand.u32 2147483648, %v2815_v3  ;;  %v2912_v18 = vpop.permute.xlu0 %1561  ;;  %v1661_v33 = vpop.permute.xlu2 %1660 }
 0x175   :  { %v886_v51 = vmul.f32 %v2859_v30, %v885_v36  ;;  %vm888_vm14 = vweird.f32 %v2815_v3  ;;  %v892_v34 = vand.u32 2147483647, %v2815_v3  ;;  %v2895_v48 = vmin.f32 %v980_v5, 16.0  ;;  %3662 = vst [vmem:[#allocation13_spill] sm:$0xff] %v2912_v18 }
 0x176   :  { %v2119_v10 = vclamps-f32 %v857_v15, 1.0  ;;  %v2897_v41 = vadd.f32 %v685_v47, %v637_v7  ;;  %vm2899_vm15 = vmor %vm888_vm14, %vm889_vm13  ;;  %v921_v13 = vmul.f32 %v920_v60, %v2786_v44  ;;  %v946_v50 = vmul.f32 %v945_v19, %v2839_v59 }
 0x177   :  { %v887_v56 = vadd.f32 %v2859_v30, %v886_v51  ;;  %v958_v22 = vadd.f32 0.112945676, %v957_v42  ;;  %v871_v27 = vadd.f32 1.1283791, %v870_v31  ;;  %1696 = vperm.xlu2 %2195, %v2821_v26   ;;  %v2118_v40 = vclamps-f32 %v817_v39, 1.0 }
 0x178   :  { %v1382_v1 = vadd.f32 1.0, %v2119_v10  ;;  %v895_v45 = vor.u32 1.1754944e-38, %v894_v11  ;;  %v904_v53 = vmul.f32 %v903_v32, %v2786_v44  ;;  %vm893_vm0 = vcmp.eq.f32.partialorder %v892_v34, 8.507059e+37 }
 0x179   :  { %v891_v3 = vsel %vm2899_vm15, %v2859_v30, %v887_v56  ;;  %v959_v54 = vmul.f32 %v958_v22, %v2839_v59  ;;  %v2918_v15 = vmul.f32 0.70710677, %v2897_v41  ;;  %vm1703_vm1 = vcmp.eq.s32.totalorder %v1661_v33, 1  ;;  %v639_v56 = vpop.f32.mrf.mxu1 }
 0x17a   :  { %v2906_v35 = vmul.f32 %v1382_v1, %v2813_v20  ;;  %v993_v20 = vmul.f32 3.8918573e-05, %v2895_v48  ;;  %v896_v36 = vsel %vm893_vm0, %v895_v45, %v891_v3  ;;  %v2920_v30 = vadd.f32 1.0, %v921_v13 }
 0x17b   :  { %v947_v26 = vadd.f32 0.05243302, %v946_v50  ;;  %v960_v4 = vadd.f32 0.4994258, %v959_v54  ;;  %v872_v5 = vmul.f32 %v871_v27, %v2724_v6  ;;  %v1020_v7 = vmul.f32 %v2918_v15, %v2918_v15 }
 0x17c   :  { %3661 = vst [vmem:[#allocation12_spill] sm:$0xff] %v2906_v35  ;;  %v1719_v10 = vsel %vm1703_vm1, %v2906_v35, 1e+30  ;;  %v905_v51 = vadd.f32 0.0036580483, %v904_v53  ;;  %v1381_v42 = vadd.f32 1.0, %v2118_v40  ;;  %2208 = vrcp.f32 %v2920_v30  ;;  %v1658_v13 = vpop.permute.xlu0 %1657 }
 0x17d   :  { %v897_v60 = vmul.f32 %v896_v36, %v872_v5  ;;  %v961_v19 = vmul.f32 %v960_v4, %v2839_v59  ;;  %v994_v31 = vadd.f32 0.001143296, %v993_v20  ;;  %v2928_v32 = vmin.f32 %v1020_v7, 16.0  ;;  %v688_v36 = vpop.f32.mrf.mxu2 }
 0x17e   :  { %v948_v39 = vmul.f32 %v947_v26, %v2839_v59  ;;  %v1734_v6 = vmin.f32 %v1719_v10, %v2866_v43  ;;  %v709_v11 = vmul.f32 0.5, %v2675_v28  ;;  %v906_v47 = vmul.f32 %v905_v51, %v2786_v44 }
 0x17f   :  { %v2933_v1 = vadd.f32 1.0, %v961_v19  ;;  %1699 = vperm.xlu2 %2195, %v2548_v55   ;;  %v1022_v34 = vmul.f32 2.1237322e-06, %v2928_v32  ;;  %v1033_v24 = vmul.f32 3.8918573e-05, %v2928_v32  ;;  %v2120_v50 = vclamps-f32 %v897_v60, 1.0 }
 0x180   :  { %v995_v22 = vmul.f32 %v994_v31, %v2895_v48  ;;  %v2942_v43 = vmul.f32 %v1381_v42, %v709_v11  ;;  %v949_v27 = vadd.f32 0.18741608, %v948_v39  ;;  %v1756_v55 = vsel %vm1703_vm1, %v2906_v35, -1e+30 }
 0x181   :  { %2210 = vrcp.f32 %v2933_v1  ;;  %v1023_v3 = vadd.f32 0.00028619796, %v1022_v34  ;;  %v1034_v40 = vadd.f32 0.001143296, %v1033_v24  ;;  %vm1702_vm2 = vcmp.eq.s32.totalorder %v1658_v13, 1 }
 0x182   :  { %3663 = vst [vmem:[#allocation14_spill] sm:$0xff] %v2942_v43  ;;  %v640_v28 = vadd.f32 %v2657_v9, %v639_v56  ;;  %v2947_v45 = vpop.eup %2208  ;;  %v907_v53 = vadd.f32 0.05243302, %v906_v47  ;;  %v982_v54 = vmul.f32 2.1237322e-06, %v2895_v48  ;;  %v1383_v26 = vadd.f32 1.0, %v2120_v50  ;;  %v641_v50 = vpop.f32.mrf.mxu1 }
 0x183   :  { %v1024_v20 = vmul.f32 %v1023_v3, %v2928_v32  ;;  %v996_v4 = vadd.f32 0.014752088, %v995_v22  ;;  %v1035_v5 = vmul.f32 %v1034_v40, %v2928_v32  ;;  %v1771_v7 = vmax.f32 %v1756_v55, %v2884_v8 }
 0x184   :  { %v711_v33 = vmul.f32 0.5, %v2715_v63  ;;  %v950_v10 = vmul.f32 %v949_v27, %v2839_v59  ;;  %v1718_v60 = vsel %vm1702_vm2, %v2942_v43, 1e+30  ;;  %v924_v31 = vmul.f32 %v2947_v45, %v2920_v30 }
 0x185   :  { %v1025_v51 = vadd.f32 0.0036580483, %v1024_v20  ;;  %v1036_v42 = vadd.f32 0.014752088, %v1035_v5  ;;  %v2959_v39 = vmin.f32 %v1718_v60, %v1734_v6  ;;  %v2961_v56 = vadd.f32 %v688_v36, %v640_v28 }
 0x186   :  { %v908_v8 = vmul.f32 %v907_v53, %v2786_v44  ;;  %v983_v59 = vadd.f32 0.00028619796, %v982_v54  ;;  %v1755_v11 = vsel %vm1702_vm2, %v2942_v43, -1e+30  ;;  %v2968_v47 = vmul.f32 %v1383_v26, %v711_v33  ;;  %v1664_v54 = vpop.permute.xlu2 %1663 }
 0x187   :  { %v2211_v19 = vpop.eup %2210  ;;  %2197 = vset.pattern.permute.xlu2 %v3645_v0  ;;  %v997_v34 = vmul.f32 %v996_v4, %v2895_v48  ;;  %v1037_v24 = vmul.f32 %v1036_v42, %v2928_v32  ;;  %v2972_v6 = vmax.f32 %v1755_v11, %v1771_v7  ;;  %v951_v22 = vadd.f32 1.1283791, %v950_v10  ;;  %v690_v10 = vpop.f32.mrf.mxu2 }
 0x188   :  { %v964_v63 = vmul.f32 %v2211_v19, %v2933_v1  ;;  %v972_v3 = vand.u32 2147483647, %v2933_v1  ;;  %v1026_v40 = vmul.f32 %v1025_v51, %v2928_v32  ;;  %v925_v55 = vsub.f32 1.0, %v924_v31 }
 0x189   :  { %v974_v28 = vand.u32 2147483648, %v2933_v1  ;;  %v1038_v13 = vadd.f32 0.112945676, %v1037_v24  ;;  %v2978_v53 = vmul.f32 0.70710677, %v2961_v56  ;;  %vm969_vm3 = vweird.f32 %v2211_v19 }
 0x18a   :  { %v965_v27 = vsub.f32 1.0, %v964_v63  ;;  %vm1704_vm4 = vcmp.eq.s32.totalorder %v1664_v54, 1  ;;  %v642_v36 = vadd.f32 %v2657_v9, %v641_v50  ;;  %vm968_vm5 = vweird.f32 %v2933_v1 }
 0x18b   :  { %v998_v26 = vadd.f32 0.112945676, %v997_v34  ;;  %v1039_v4 = vmul.f32 %v1038_v13, %v2928_v32  ;;  %v1060_v5 = vmul.f32 %v2978_v53, %v2978_v53  ;;  %v1027_v33 = vadd.f32 0.05243302, %v1026_v40  ;;  %vm970_vm6 = vmor %vm968_vm5, %vm969_vm3 }
 0x18c   :  { %v966_v20 = vmul.f32 %v2211_v19, %v965_v27  ;;  %v1720_v51 = vsel %vm1704_vm4, %v2968_v47, 1e+30  ;;  %v1757_v60 = vsel %vm1704_vm4, %v2968_v47, -1e+30  ;;  %v909_v31 = vadd.f32 0.18741608, %v908_v8 }
 0x18d   :  { %v952_v42 = vmul.f32 %v951_v22, %v2807_v17  ;;  %v975_v63 = vor.u32 1.1754944e-38, %v974_v28  ;;  %v2988_v11 = vadd.f32 %v690_v10, %v642_v36  ;;  %vm973_vm7 = vcmp.eq.f32.partialorder %v972_v3, 8.507059e+37 }
 0x18e   :  { %v967_v7 = vadd.f32 %v2211_v19, %v966_v20  ;;  %v1040_v34 = vadd.f32 0.4994258, %v1039_v4  ;;  %v2990_v24 = vmin.f32 %v1060_v5, 16.0  ;;  %v984_v27 = vmul.f32 %v983_v59, %v2895_v48 }
 0x18f   :  { %v999_v40 = vmul.f32 %v998_v26, %v2895_v48  ;;  %v1733_v13 = vmin.f32 %v1720_v51, %v2959_v39  ;;  %v926_v8 = vmul.f32 %v2947_v45, %v925_v55  ;;  %v1028_v17 = vmul.f32 %v1027_v33, %v2928_v32  ;;  %v1670_v51 = vpop.permute.xlu2 %1669 }
 0x190   :  { %v971_v1 = vsel %vm970_vm6, %v2211_v19, %v967_v7  ;;  %v1041_v22 = vmul.f32 %v1040_v34, %v2928_v32  ;;  %v910_v19 = vmul.f32 %v909_v31, %v2786_v44  ;;  %v1073_v3 = vmul.f32 3.8918573e-05, %v2990_v24  ;;  %v644_v7 = vpop.f32.mrf.mxu1 }
 0x191   :  { %v976_v50 = vsel %vm973_vm7, %v975_v63, %v971_v1  ;;  %v1770_v28 = vmax.f32 %v1757_v60, %v2972_v6  ;;  %v3002_v20 = vmul.f32 0.70710677, %v2988_v11  ;;  %v934_v59 = vand.u32 2147483648, %v2920_v30 }
 0x192   :  { %v977_v54 = vmul.f32 %v976_v50, %v952_v42  ;;  %v713_v39 = vmul.f32 0.5, %v2794_v52  ;;  %v3006_v55 = vadd.f32 1.0, %v1041_v22  ;;  %v985_v26 = vadd.f32 0.0036580483, %v984_v27 }
 0x193   :  { %v1000_v4 = vadd.f32 0.4994258, %v999_v40  ;;  %v1074_v5 = vadd.f32 0.001143296, %v1073_v3  ;;  %v1100_v44 = vmul.f32 %v3002_v20, %v3002_v20  ;;  %v927_v33 = vadd.f32 %v2947_v45, %v926_v8  ;;  %v693_v3 = vpop.f32.mrf.mxu2 }
 0x194   :  { %v2122_v36 = vclamps-f32 %v977_v54, 1.0  ;;  %vm929_vm8 = vweird.f32 %v2947_v45  ;;  %v1029_v10 = vadd.f32 0.18741608, %v1028_v17  ;;  %v911_v60 = vadd.f32 1.1283791, %v910_v19 }
 0x195   :  { %vm928_vm9 = vweird.f32 %v2920_v30  ;;  %2212 = vrcp.f32 %v3006_v55  ;;  %vm1706_vm10 = vcmp.eq.s32.totalorder %v1670_v51, 1  ;;  %v932_v52 = vand.u32 2147483647, %v2920_v30 }
 0x196   :  { %v1385_v6 = vadd.f32 1.0, %v2122_v36  ;;  %v1075_v42 = vmul.f32 %v1074_v5, %v2990_v24  ;;  %v645_v63 = vadd.f32 %v2657_v9, %v644_v7  ;;  %vm3019_vm11 = vmor %vm928_vm9, %vm929_vm8  ;;  %v935_v34 = vor.u32 1.1754944e-38, %v934_v59 }
 0x197   :  { %v986_v50 = vmul.f32 %v985_v26, %v2895_v48  ;;  %v1001_v27 = vmul.f32 %v1000_v4, %v2895_v48  ;;  %v3025_v40 = vmin.f32 %v1100_v44, 16.0  ;;  %v931_v30 = vsel %vm3019_vm11, %v2947_v45, %v927_v33 }
 0x198   :  { %v3015_v31 = vmul.f32 %v1385_v6, %v713_v39  ;;  %v1030_v8 = vmul.f32 %v1029_v10, %v2928_v32  ;;  %v1076_v54 = vadd.f32 0.014752088, %v1075_v42  ;;  %vm933_vm12 = vcmp.eq.f32.partialorder %v932_v52, 8.507059e+37 }
 0x199   :  { %v1102_v22 = vmul.f32 2.1237322e-06, %v3025_v40  ;;  %v1113_v19 = vmul.f32 3.8918573e-05, %v3025_v40  ;;  %v3042_v32 = vadd.f32 %v693_v3, %v645_v63  ;;  %v936_v4 = vsel %vm933_vm12, %v935_v34, %v931_v30 }
 0x19a   :  { %3664 = vst [vmem:[#allocation15_spill] sm:$0xff] %v3015_v31  ;;  %v1722_v17 = vsel %vm1706_vm10, %v3015_v31, 1e+30  ;;  %v1759_v39 = vsel %vm1706_vm10, %v3015_v31, -1e+30  ;;  %v1077_v36 = vmul.f32 %v1076_v54, %v2990_v24  ;;  %v3044_v5 = vadd.f32 1.0, %v1001_v27 }
 0x19b   :  { %v3035_v59 = vmin.f32 %v1722_v17, %v1733_v13  ;;  %v3040_v45 = vmax.f32 %v1759_v39, %v1770_v28  ;;  %v2213_v26 = vpop.eup %2212  ;;  %v1103_v44 = vadd.f32 0.00028619796, %v1102_v22  ;;  %v1114_v7 = vadd.f32 0.001143296, %v1113_v19 }
 0x19c   :  { %v912_v33 = vmul.f32 %v911_v60, %v2769_v49  ;;  %v1044_v13 = vmul.f32 %v2213_v26, %v3006_v55  ;;  %v987_v6 = vadd.f32 0.05243302, %v986_v50  ;;  %v1031_v10 = vadd.f32 1.1283791, %v1030_v8 }
 0x19d   :  { %v1104_v51 = vmul.f32 %v1103_v44, %v3025_v40  ;;  %v1115_v52 = vmul.f32 %v1114_v7, %v3025_v40  ;;  %v1078_v63 = vadd.f32 0.112945676, %v1077_v36  ;;  %v3051_v1 = vmul.f32 0.70710677, %v3042_v32 }
 0x19e   :  { %v937_v28 = vmul.f32 %v936_v4, %v912_v33  ;;  %v1045_v42 = vsub.f32 1.0, %v1044_v13  ;;  %2214 = vrcp.f32 %v3044_v5  ;;  %v1054_v34 = vand.u32 2147483648, %v3006_v55 }
 0x19f   :  { %v1105_v27 = vadd.f32 0.0036580483, %v1104_v51  ;;  %v1116_v49 = vadd.f32 0.014752088, %v1115_v52  ;;  %vm1049_vm13 = vweird.f32 %v2213_v26  ;;  %v1052_v50 = vand.u32 2147483647, %v3006_v55 }
 0x1a0   :  { %v1046_v60 = vmul.f32 %v2213_v26, %v1045_v42  ;;  %v1140_v30 = vmul.f32 %v3051_v1, %v3051_v1  ;;  %v988_v8 = vmul.f32 %v987_v6, %v2895_v48  ;;  %vm1048_vm14 = vweird.f32 %v3006_v55 }
 0x1a1   :  { %v1117_v54 = vmul.f32 %v1116_v49, %v3025_v40  ;;  %v1079_v22 = vmul.f32 %v1078_v63, %v2990_v24  ;;  %v1106_v19 = vmul.f32 %v1105_v27, %v3025_v40  ;;  %vm1050_vm15 = vmor %vm1048_vm14, %vm1049_vm13  ;;  %v1055_v39 = vor.u32 1.1754944e-38, %v1054_v34  ;;  %v646_v34 = vpop.f32.mrf.mxu1 }
 0x1a2   :  { %v1047_v17 = vadd.f32 %v2213_v26, %v1046_v60  ;;  %v3063_v3 = vmin.f32 %v1140_v30, 16.0  ;;  %v2121_v4 = vclamps-f32 %v937_v28, 1.0  ;;  %v1032_v44 = vmul.f32 %v1031_v10, %v2918_v15 }
 0x1a3   :  { %v1118_v36 = vadd.f32 0.112945676, %v1117_v54  ;;  %vm1053_vm0 = vcmp.eq.f32.partialorder %v1052_v50, 8.507059e+37  ;;  %v989_v55 = vadd.f32 0.18741608, %v988_v8  ;;  %vm1564_vm1 = vcmp.eq.s32.totalorder %v2666_v46, 1 }
 0x1a4   :  { %v1051_v7 = vsel %vm1050_vm15, %v2213_v26, %v1047_v17  ;;  %v3066_v33 = vpop.eup %2214  ;;  %v1062_v6 = vmul.f32 2.1237322e-06, %v2990_v24  ;;  %v1080_v42 = vadd.f32 0.4994258, %v1079_v22  ;;  %v1107_v63 = vadd.f32 0.05243302, %v1106_v19 }
 0x1a5   :  { %v1056_v13 = vsel %vm1053_vm0, %v1055_v39, %v1051_v7  ;;  %v1119_v51 = vmul.f32 %v1118_v36, %v3025_v40  ;;  %v1153_v27 = vmul.f32 3.8918573e-05, %v3063_v3  ;;  %vm1568_vm2 = vcmp.eq.s32.totalorder %v2712_v61, 1  ;;  %v1667_v36 = vpop.permute.xlu0 %1666 }
 0x1a6   :  { %v1057_v52 = vmul.f32 %v1056_v13, %v1032_v44  ;;  %v712_v15 = vmul.f32 0.5, %v2739_v25  ;;  %v715_v26 = vmul.f32 0.5, %v2897_v41  ;;  %v1384_v10 = vadd.f32 1.0, %v2121_v4  ;;  %v695_v41 = vpop.f32.mrf.mxu2 }
 0x1a7   :  { %v1004_v28 = vmul.f32 %v3066_v33, %v3044_v5  ;;  %v1120_v60 = vadd.f32 0.4994258, %v1119_v51  ;;  %v990_v50 = vmul.f32 %v989_v55, %v2895_v48  ;;  %v1063_v30 = vadd.f32 0.00028619796, %v1062_v6  ;;  %v1676_v6 = vpop.permute.xlu2 %1675 }
 0x1a8   :  { %v2124_v49 = vclamps-f32 %v1057_v52, 1.0  ;;  %v1154_v8 = vadd.f32 0.001143296, %v1153_v27  ;;  %v647_v54 = vadd.f32 %v2657_v9, %v646_v34  ;;  %v1081_v22 = vmul.f32 %v1080_v42, %v2990_v24 }
 0x1a9   :  { %v1108_v19 = vmul.f32 %v1107_v63, %v3025_v40  ;;  %v1121_v25 = vmul.f32 %v1120_v60, %v3025_v40  ;;  %v3088_v48 = vsel %vm1564_vm1, %v2942_v43, 1e+30  ;;  %v3093_v9 = vsel %vm1568_vm2, %v3015_v31, 1e+30 }
 0x1aa   :  { %v1387_v17 = vadd.f32 1.0, %v2124_v49  ;;  %v1155_v39 = vmul.f32 %v1154_v8, %v3063_v3  ;;  %v3083_v4 = vadd.f32 %v695_v41, %v647_v54  ;;  %v3095_v44 = vmul.f32 %v1384_v10, %v712_v15 }
 0x1ab   :  { %v1005_v7 = vsub.f32 1.0, %v1004_v28  ;;  %v3099_v13 = vadd.f32 1.0, %v1121_v25  ;;  %v1064_v51 = vmul.f32 %v1063_v30, %v2990_v24  ;;  %vm1708_vm3 = vcmp.eq.s32.totalorder %v1676_v6, 1 }
 0x1ac   :  { %v3097_v55 = vmul.f32 %v1387_v17, %v715_v26  ;;  %v1156_v52 = vadd.f32 0.014752088, %v1155_v39  ;;  %vm1705_vm4 = vcmp.eq.s32.totalorder %v1667_v36, 1  ;;  %v3106_v63 = vmul.f32 0.70710677, %v3083_v4  ;;  %v649_v39 = vpop.f32.mrf.mxu1 }
 0x1ad   :  { %2216 = vrcp.f32 %v3099_v13  ;;  %v3108_v27 = vadd.f32 1.1283791, %v990_v50  ;;  %v3110_v34 = vadd.f32 1.0, %v1081_v22  ;;  %v1109_v15 = vadd.f32 0.18741608, %v1108_v19 }
 0x1ae   :  { %vm1565_vm5 = vcmp.eq.s32.totalorder %v2730_v16, 1  ;;  %v1142_v26 = vmul.f32 2.1237322e-06, %v3063_v3  ;;  %v1157_v10 = vmul.f32 %v1156_v52, %v3063_v3  ;;  %v1724_v28 = vsel %vm1708_vm3, %v3097_v55, 1e+30 }
 0x1af   :  { %v1761_v49 = vsel %vm1708_vm3, %v3097_v55, -1e+30  ;;  %v1006_v60 = vmul.f32 %v3066_v33, %v1005_v7  ;;  %v1065_v30 = vadd.f32 0.0036580483, %v1064_v51  ;;  %v1737_v8 = vmin.f32 %v1724_v28, %v3035_v59 }
 0x1b0   :  { %v1721_v50 = vsel %vm1705_vm4, %v3095_v44, 1e+30  ;;  %v1158_v54 = vadd.f32 0.112945676, %v1157_v10  ;;  %v1774_v17 = vmax.f32 %v1761_v49, %v3040_v45  ;;  %v1758_v22 = vsel %vm1705_vm4, %v3095_v44, -1e+30 }
 0x1b1   :  { %v1180_v19 = vmul.f32 %v3106_v63, %v3106_v63  ;;  %2218 = vrcp.f32 %v3110_v34  ;;  %v1110_v25 = vmul.f32 %v1109_v15, %v3025_v40  ;;  %v3128_v41 = vmin.f32 %v1721_v50, %v1737_v8 }
 0x1b2   :  { %v3133_v59 = vsel %vm1564_vm1, %v2942_v43, -1e+30  ;;  %v1143_v45 = vadd.f32 0.00028619796, %v1142_v26  ;;  %v3135_v6 = vmax.f32 %v1758_v22, %v1774_v17  ;;  %v3142_v51 = vsel %vm1568_vm2, %v3015_v31, -1e+30 }
 0x1b3   :  { %v2217_v7 = vpop.eup %2216  ;;  %v3137_v36 = vmin.f32 %v1180_v19, 16.0  ;;  %vm1008_vm6 = vweird.f32 %v3044_v5  ;;  %vm1009_vm7 = vweird.f32 %v3066_v33  ;;  %v1012_v46 = vand.u32 2147483647, %v3044_v5 }
 0x1b4   :  { %v1124_v40 = vmul.f32 %v2217_v7, %v3099_v13  ;;  %v1007_v52 = vadd.f32 %v3066_v33, %v1006_v60  ;;  %v1066_v15 = vmul.f32 %v1065_v30, %v2990_v24  ;;  %v1159_v26 = vmul.f32 %v1158_v54, %v3063_v3  ;;  %vm3164_vm8 = vmor %vm1008_vm6, %vm1009_vm7 }
 0x1b5   :  { %v1193_v10 = vmul.f32 3.8918573e-05, %v3137_v36  ;;  %v1014_v61 = vand.u32 2147483648, %v3044_v5  ;;  %v1111_v28 = vadd.f32 1.1283791, %v1110_v25  ;;  %v1134_v17 = vand.u32 2147483648, %v3099_v13  ;;  %v698_v25 = vpop.f32.mrf.mxu2 }
 0x1b6   :  { %v1125_v49 = vsub.f32 1.0, %v1124_v40  ;;  %v1132_v50 = vand.u32 2147483647, %v3099_v13  ;;  %v1144_v22 = vmul.f32 %v1143_v45, %v3063_v3  ;;  %vm1129_vm9 = vweird.f32 %v2217_v7  ;;  %v3171_v40 = vld [vmem:[%s3641_s6] ss:$0 sm:$0xff] }
 0x1b7   :  { %v1194_v60 = vadd.f32 0.001143296, %v1193_v10  ;;  %v3158_v19 = vpop.eup %2218  ;;  %v650_v45 = vadd.f32 %v3171_v40, %v649_v39  ;;  %v3177_v10 = vsel %vm1565_vm5, %v2906_v35, 1e+30  ;;  %v1011_v5 = vsel %vm3164_vm8, %v3066_v33, %v1007_v52 }
 0x1b8   :  { %v1126_v54 = vmul.f32 %v2217_v7, %v1125_v49  ;;  %v1067_v0 = vadd.f32 0.05243302, %v1066_v15  ;;  %v1160_v49 = vadd.f32 0.4994258, %v1159_v26  ;;  %vm1128_vm10 = vweird.f32 %v3099_v13 }
 0x1b9   :  { %v1195_v8 = vmul.f32 %v1194_v60, %v3137_v36  ;;  %v1182_v43 = vmul.f32 2.1237322e-06, %v3137_v36  ;;  %v3188_v39 = vsel %vm1565_vm5, %v2906_v35, -1e+30  ;;  %v1084_v31 = vmul.f32 %v3158_v19, %v3110_v34  ;;  %vm1130_vm11 = vmor %vm1128_vm10, %vm1129_vm9  ;;  %v651_v60 = vpop.f32.mrf.mxu1 }
 0x1ba   :  { %v1127_v42 = vadd.f32 %v2217_v7, %v1126_v54  ;;  %3669 = vst [vmem:[#allocation16_spill] sm:$0xff] %v3188_v39  ;;  %v1135_v30 = vor.u32 1.1754944e-38, %v1134_v17  ;;  %v1145_v33 = vadd.f32 0.0036580483, %v1144_v22  ;;  %v3192_v52 = vadd.f32 %v698_v25, %v650_v45 }
 0x1bb   :  { %v1112_v15 = vmul.f32 %v1111_v28, %v3002_v20  ;;  %vm1133_vm12 = vcmp.eq.f32.partialorder %v1132_v50, 8.507059e+37  ;;  %v1196_v13 = vadd.f32 0.014752088, %v1195_v8  ;;  %v1015_v54 = vor.u32 1.1754944e-38, %v1014_v61  ;;  %v1544_v8 = vpop.permute.xlu2 %1543 }
 0x1bc   :  { %v1131_v26 = vsel %vm1130_vm11, %v2217_v7, %v1127_v42  ;;  %v1161_v16 = vmul.f32 %v1160_v49, %v3063_v3  ;;  %vm1013_vm13 = vcmp.eq.f32.partialorder %v1012_v46, 8.507059e+37  ;;  %v1183_v39 = vadd.f32 0.00028619796, %v1182_v43 }
 0x1bd   :  { %v1136_v18 = vsel %vm1133_vm12, %v1135_v30, %v1131_v26  ;;  %v1197_v12 = vmul.f32 %v1196_v13, %v3137_v36  ;;  %v992_v17 = vmul.f32 %v3108_v27, %v2857_v14  ;;  %v1016_v22 = vsel %vm1013_vm13, %v1015_v54, %v1011_v5 }
 0x1be   :  { %v1137_v35 = vmul.f32 %v1136_v18, %v1112_v15  ;;  %v1068_v25 = vmul.f32 %v1067_v0, %v2990_v24  ;;  %v3201_v20 = vmul.f32 0.70710677, %v3192_v52  ;;  %v1085_v42 = vsub.f32 1.0, %v1084_v31  ;;  %v700_v31 = vpop.f32.mrf.mxu2 }
 0x1bf   :  { %v1146_v61 = vmul.f32 %v1145_v33, %v3063_v3  ;;  %v1198_v28 = vadd.f32 0.112945676, %v1197_v12  ;;  %vm1563_vm14 = vcmp.eq.s32.totalorder %v2699_v38, 1  ;;  %v717_v18 = vmul.f32 0.5, %v2988_v11 }
 0x1c0   :  { %v2126_v7 = vclamps-f32 %v1137_v35, 1.0  ;;  %v3206_v43 = vadd.f32 1.0, %v1161_v16  ;;  %v1220_v14 = vmul.f32 %v3201_v20, %v3201_v20  ;;  %v3210_v27 = vmul.f32 %v1016_v22, %v992_v17 }
 0x1c1   :  { %v1184_v46 = vmul.f32 %v1183_v39, %v3137_v36  ;;  %v652_v35 = vadd.f32 %v3171_v40, %v651_v60  ;;  %v1069_v50 = vadd.f32 0.18741608, %v1068_v25  ;;  %v1199_v12 = vmul.f32 %v1198_v28, %v3137_v36  ;;  %v654_v16 = vpop.f32.mrf.mxu1 }
 0x1c2   :  { %v1389_v0 = vadd.f32 1.0, %v2126_v7  ;;  %vm1572_vm15 = vcmp.eq.s32.totalorder %v1544_v8, 1  ;;  %v3215_v45 = vmin.f32 %v1220_v14, 16.0  ;;  %v1086_v11 = vmul.f32 %v3158_v19, %v1085_v42 }
 0x1c3   :  { %v1147_v49 = vadd.f32 0.05243302, %v1146_v61  ;;  %v3223_v30 = vsel %vm1563_vm14, %v2836_v57, 1e+30  ;;  %2220 = vrcp.f32 %v3206_v43  ;;  %v1200_v39 = vadd.f32 0.4994258, %v1199_v12 }
 0x1c4   :  { %v3218_v5 = vmul.f32 %v1389_v0, %v717_v18  ;;  %v1222_v33 = vmul.f32 2.1237322e-06, %v3215_v45  ;;  %v1233_v15 = vmul.f32 3.8918573e-05, %v3215_v45  ;;  %v1185_v26 = vadd.f32 0.0036580483, %v1184_v46 }
 0x1c5   :  { %v3230_v54 = vadd.f32 %v700_v31, %v652_v35  ;;  %v1070_v17 = vmul.f32 %v1069_v50, %v2990_v24  ;;  %v3671_v22 = vmin.f32 %v3088_v48, %v3093_v9  ;;  %v3672_v42 = vmax.f32 %v3133_v59, %v3142_v51  ;;  %v3253_v59 = vld [vmem:[%s3639_s4] sm:$0x3] }
 0x1c6   :  { %3670 = vst [vmem:[#allocation17_spill] sm:$0xff] %v3218_v5  ;;  %v1588_v13 = vsel %vm1572_vm15, %v3218_v5, 1e+30  ;;  %v1625_v60 = vsel %vm1572_vm15, %v3218_v5, -1e+30  ;;  %v1087_v28 = vadd.f32 %v3158_v19, %v1086_v11  ;;  %vm1089_vm0 = vweird.f32 %v3158_v19  ;;  %1808 = vperm.xlu2 %2197, %v3253_v59  }
 0x1c7   :  { %v3236_v25 = vmin.f32 %v3671_v22, %v1588_v13  ;;  %v3241_v7 = vmax.f32 %v3672_v42, %v1625_v60  ;;  %v1223_v61 = vadd.f32 0.00028619796, %v1222_v33  ;;  %v1148_v18 = vmul.f32 %v1147_v49, %v3063_v3  ;;  %v703_v33 = vpop.f32.mrf.mxu2 }
 0x1c8   :  { %v1234_v14 = vadd.f32 0.001143296, %v1233_v15  ;;  %vm1088_vm1 = vweird.f32 %v3110_v34  ;;  %v1094_v24 = vand.u32 2147483648, %v3110_v34  ;;  %v1201_v48 = vmul.f32 %v1200_v39, %v3137_v36 }
 0x1c9   :  { %v655_v9 = vadd.f32 %v3171_v40, %v654_v16  ;;  %v1092_v51 = vand.u32 2147483647, %v3110_v34  ;;  %v1186_v0 = vmul.f32 %v1185_v26, %v3137_v36  ;;  %v3259_v8 = vmul.f32 0.70710677, %v3230_v54  ;;  %v3262_v31 = vpop.eup %2220  ;;  %vm3267_vm2 = vmor %vm1088_vm1, %vm1089_vm0 }
 0x1ca   :  { %v1235_v46 = vmul.f32 %v1234_v14, %v3215_v45  ;;  %v2123_v35 = vclamps-f32 %v3210_v27, 1.0  ;;  %v1224_v34 = vmul.f32 %v1223_v61, %v3215_v45  ;;  %v1071_v12 = vadd.f32 1.1283791, %v1070_v17  ;;  %v3277_v27 = vpop.permute.xlu2 %1546 }
 0x1cb   :  { %v1091_v11 = vsel %vm3267_vm2, %v3158_v19, %v1087_v28  ;;  %v1149_v49 = vadd.f32 0.18741608, %v1148_v18  ;;  %v1095_v15 = vor.u32 1.1754944e-38, %v1094_v24  ;;  %v3275_v26 = vadd.f32 1.0, %v1201_v48 }
 0x1cc   :  { %v1236_v39 = vadd.f32 0.014752088, %v1235_v46  ;;  %v1260_v13 = vmul.f32 %v3259_v8, %v3259_v8  ;;  %v3281_v60 = vadd.f32 %v703_v33, %v655_v9  ;;  %vm1093_vm3 = vcmp.eq.f32.partialorder %v1092_v51, 8.507059e+37 }
 0x1cd   :  { %v1164_v16 = vmul.f32 %v3262_v31, %v3206_v43  ;;  %v1187_v17 = vadd.f32 0.05243302, %v1186_v0  ;;  %v1096_v22 = vsel %vm1093_vm3, %v1095_v15, %v1091_v11  ;;  %v1225_v42 = vadd.f32 0.0036580483, %v1224_v34 }
 0x1ce   :  { %v1237_v19 = vmul.f32 %v1236_v39, %v3215_v45  ;;  %v3286_v61 = vmin.f32 %v1260_v13, 16.0  ;;  %v1072_v28 = vmul.f32 %v1071_v12, %v2978_v53  ;;  %v1150_v18 = vmul.f32 %v1149_v49, %v3063_v3 }
 0x1cf   :  { %2222 = vrcp.f32 %v3275_v26  ;;  %v3294_v9 = vmul.f32 0.70710677, %v3281_v60  ;;  %v1386_v51 = vadd.f32 1.0, %v2123_v35  ;;  %v1165_v46 = vsub.f32 1.0, %v1164_v16 }
 0x1d0   :  { %v1238_v14 = vadd.f32 0.112945676, %v1237_v19  ;;  %v1262_v24 = vmul.f32 2.1237322e-06, %v3286_v61  ;;  %v1273_v48 = vmul.f32 3.8918573e-05, %v3286_v61  ;;  %v1097_v0 = vmul.f32 %v1096_v22, %v1072_v28 }
 0x1d1   :  { %v1188_v50 = vmul.f32 %v1187_v17, %v3137_v36  ;;  %v1226_v34 = vmul.f32 %v1225_v42, %v3215_v45  ;;  %v714_v11 = vmul.f32 0.5, %v2841_v62  ;;  %v1151_v49 = vadd.f32 1.1283791, %v1150_v18  ;;  %v656_v42 = vpop.f32.mrf.mxu1 }
 0x1d2   :  { %v1239_v53 = vmul.f32 %v1238_v14, %v3215_v45  ;;  %v1263_v3 = vadd.f32 0.00028619796, %v1262_v24  ;;  %v1274_v12 = vadd.f32 0.001143296, %v1273_v48  ;;  %v1300_v39 = vmul.f32 %v3294_v9, %v3294_v9  ;;  %v3314_v14 = vpop.permute.xlu2 %1678 }
 0x1d3   :  { %v716_v33 = vmul.f32 0.5, %v2961_v56  ;;  %v3304_v35 = vmul.f32 0.5, %v3042_v32  ;;  %v3307_v16 = vmul.f32 %v1386_v51, %v714_v11  ;;  %v2125_v17 = vclamps-f32 %v1097_v0, 1.0 }
 0x1d4   :  { %v1240_v15 = vadd.f32 0.4994258, %v1239_v53  ;;  %v1264_v13 = vmul.f32 %v1263_v3, %v3286_v61  ;;  %v1189_v19 = vadd.f32 0.18741608, %v1188_v50  ;;  %v1275_v22 = vmul.f32 %v1274_v12, %v3286_v61 }
 0x1d5   :  { %v3310_v62 = vpop.eup %2222  ;;  %v1166_v28 = vmul.f32 %v3262_v31, %v1165_v46  ;;  %v1227_v18 = vadd.f32 0.05243302, %v1226_v34  ;;  %v3316_v32 = vmin.f32 %v1300_v39, 16.0  ;;  %v3319_v24 = vmul.f32 %v1151_v49, %v3051_v1 }
 0x1d6   :  { %v1241_v56 = vmul.f32 %v1240_v15, %v3215_v45  ;;  %v1172_v48 = vand.u32 2147483647, %v3206_v43  ;;  %v1265_v51 = vadd.f32 0.0036580483, %v1264_v13  ;;  %v1276_v0 = vadd.f32 0.014752088, %v1275_v22  ;;  %v705_v13 = vpop.f32.mrf.mxu2 }
 0x1d7   :  { %v1302_v53 = vmul.f32 2.1237322e-06, %v3316_v32  ;;  %v1313_v46 = vmul.f32 3.8918573e-05, %v3316_v32  ;;  %v657_v34 = vadd.f32 %v3171_v40, %v656_v42  ;;  %v1388_v3 = vadd.f32 1.0, %v2125_v17 }
 0x1d8   :  { %v3322_v50 = vadd.f32 1.0, %v1241_v56  ;;  %v1190_v12 = vmul.f32 %v1189_v19, %v3137_v36  ;;  %v1204_v11 = vmul.f32 %v3310_v62, %v3275_v26  ;;  %v1277_v1 = vmul.f32 %v1276_v0, %v3286_v61 }
 0x1d9   :  { %v1167_v49 = vadd.f32 %v3262_v31, %v1166_v28  ;;  %vm1169_vm4 = vweird.f32 %v3262_v31  ;;  %v1228_v39 = vmul.f32 %v1227_v18, %v3215_v45  ;;  %vm1168_vm5 = vweird.f32 %v3206_v43 }
 0x1da   :  { %2224 = vrcp.f32 %v3322_v50  ;;  %v1174_v40 = vand.u32 2147483648, %v3206_v43  ;;  %v1266_v15 = vmul.f32 %v1265_v51, %v3286_v61  ;;  %v1278_v36 = vadd.f32 0.112945676, %v1277_v1  ;;  %vm3344_vm7 = vmor %vm1168_vm5, %vm1169_vm4 }
 0x1db   :  { %vm3338_vm6 = vcmp.eq.f32.partialorder %v1172_v48, 8.507059e+37  ;;  %v1303_v19 = vadd.f32 0.00028619796, %v1302_v53  ;;  %v1314_v22 = vadd.f32 0.001143296, %v1313_v46  ;;  %v3342_v42 = vadd.f32 %v705_v13, %v657_v34 }
 0x1dc   :  { %v3348_v18 = vadd.f32 1.1283791, %v1190_v12  ;;  %v1205_v56 = vsub.f32 1.0, %v1204_v11  ;;  %v3351_v43 = vmul.f32 0.5, %v3192_v52  ;;  %v1279_v51 = vmul.f32 %v1278_v36, %v3286_v61  ;;  %v3362_v36 = vpop.permute.xlu2 %1684 }
 0x1dd   :  { %3677 = vst [vmem:[#allocation18_spill] sm:$0xff] %v3342_v42  ;;  %v1171_v48 = vsel %vm3344_vm7, %v3262_v31, %v1167_v49  ;;  %v1229_v0 = vadd.f32 0.18741608, %v1228_v39  ;;  %v1304_v53 = vmul.f32 %v1303_v19, %v3316_v32  ;;  %v1315_v46 = vmul.f32 %v1314_v22, %v3316_v32 }
 0x1de   :  { %v1175_v34 = vor.u32 1.1754944e-38, %v1174_v40  ;;  %v1267_v1 = vadd.f32 0.05243302, %v1266_v15  ;;  %v1280_v13 = vadd.f32 0.4994258, %v1279_v51  ;;  %vm1804_vm8 = vcmp.gt.f32.partialorder %v3253_v59, 0.0 }
 0x1df   :  { %v3360_v11 = vmul.f32 %v1388_v3, %v716_v33  ;;  %v1305_v52 = vadd.f32 0.0036580483, %v1304_v53  ;;  %v1316_v5 = vadd.f32 0.014752088, %v1315_v46  ;;  %v3365_v28 = vmul.f32 0.70710677, %v3342_v42 }
 0x1e0   :  { %v2225_v12 = vpop.eup %2224  ;;  %v1176_v31 = vsel %vm3338_vm6, %v1175_v34, %v1171_v48  ;;  %v1206_v49 = vmul.f32 %v3310_v62, %v1205_v56  ;;  %v1212_v39 = vand.u32 2147483647, %v3275_v26  ;;  %v1230_v15 = vmul.f32 %v1229_v0, %v3215_v45 }
 0x1e1   :  { %v1244_v40 = vmul.f32 %v2225_v12, %v3322_v50  ;;  %v1281_v33 = vmul.f32 %v1280_v13, %v3286_v61  ;;  %v1317_v3 = vmul.f32 %v1316_v5, %v3316_v32  ;;  %v1340_v19 = vmul.f32 %v3365_v28, %v3365_v28 }
 0x1e2   :  { %vm1567_vm9 = vcmp.eq.s32.totalorder %v2763_v2, 1  ;;  %v1254_v17 = vand.u32 2147483648, %v3322_v50  ;;  %v1306_v56 = vmul.f32 %v1305_v52, %v3316_v32  ;;  %v3680_v51 = vmov 0  }
 0x1e3   :  { %v1245_v22 = vsub.f32 1.0, %v1244_v40  ;;  %v1813_v48 = vsel %vm1804_vm8, 1, %v3680_v51  ;;  %v1268_v45 = vmul.f32 %v1267_v1, %v3286_v61  ;;  %v3384_v0 = vadd.f32 1.0, %v1281_v33 }
 0x1e4   :  { %v1318_v53 = vadd.f32 0.112945676, %v1317_v3  ;;  %v3386_v5 = vmin.f32 %v1340_v19, 16.0  ;;  %1815 = vperm.xlu0 %2196, %v1813_v48   ;;  %v1214_v46 = vand.u32 2147483648, %v3275_v26  ;;  %vm1249_vm10 = vweird.f32 %v2225_v12 }
 0x1e5   :  { %v1246_v34 = vmul.f32 %v2225_v12, %v1245_v22  ;;  %v1252_v13 = vand.u32 2147483647, %v3322_v50  ;;  %vm1209_vm11 = vweird.f32 %v3310_v62  ;;  %v1231_v52 = vadd.f32 1.1283791, %v1230_v15 }
 0x1e6   :  { %vm1248_vm12 = vweird.f32 %v3322_v50  ;;  %2226 = vrcp.f32 %v3384_v0  ;;  %v1307_v1 = vadd.f32 0.05243302, %v1306_v56  ;;  %v1319_v40 = vmul.f32 %v1318_v53, %v3316_v32  ;;  %v3399_v53 = vpop.permute.xlu2 %1687 }
 0x1e7   :  { %v1247_v59 = vadd.f32 %v2225_v12, %v1246_v34  ;;  %v1342_v33 = vmul.f32 2.1237322e-06, %v3386_v5  ;;  %v1207_v3 = vadd.f32 %v3310_v62, %v1206_v49  ;;  %vm1250_vm13 = vmor %vm1248_vm12, %vm1249_vm10  ;;  %v1255_v19 = vor.u32 1.1754944e-38, %v1254_v17 }
 0x1e8   :  { %v1269_v22 = vadd.f32 0.18741608, %v1268_v45  ;;  %v1353_v51 = vmul.f32 3.8918573e-05, %v3386_v5  ;;  %vm1253_vm15 = vcmp.eq.f32.partialorder %v1252_v13, 8.507059e+37  ;;  %v1177_v50 = vmul.f32 %v1176_v31, %v3319_v24 }
 0x1e9   :  { %v1251_v48 = vsel %vm1250_vm13, %v2225_v12, %v1247_v59  ;;  %v1320_v15 = vadd.f32 0.4994258, %v1319_v40  ;;  %v1343_v42 = vadd.f32 0.00028619796, %v1342_v33  ;;  %vm1208_vm0 = vweird.f32 %v3275_v26 }
 0x1ea   :  { %v1256_v56 = vsel %vm1253_vm15, %v1255_v19, %v1251_v48  ;;  %v1354_v34 = vadd.f32 0.001143296, %v1353_v51  ;;  %vm1566_vm1 = vcmp.eq.s32.totalorder %v2685_v23, 1  ;;  %vm3404_vm2 = vmor %vm1208_vm0, %vm1209_vm11  ;;  %v1232_v12 = vmul.f32 %v1231_v52, %v3201_v20 }
 0x1eb   :  { %v1308_v17 = vmul.f32 %v1307_v1, %v3316_v32  ;;  %v1321_v24 = vmul.f32 %v1320_v15, %v3316_v32  ;;  %v1344_v26 = vmul.f32 %v1343_v42, %v3386_v5  ;;  %v1211_v45 = vsel %vm3404_vm2, %v3310_v62, %v1207_v3 }
 0x1ec   :  { %v2227_v31 = vpop.eup %2226  ;;  %v1270_v13 = vmul.f32 %v1269_v22, %v3286_v61  ;;  %v1355_v59 = vmul.f32 %v1354_v34, %v3386_v5  ;;  %v3420_v40 = vsel %vm1567_vm9, %v3095_v44, 1e+30  ;;  %vm1213_vm3 = vcmp.eq.f32.partialorder %v1212_v39, 8.507059e+37 }
 0x1ed   :  { %v1215_v20 = vor.u32 1.1754944e-38, %v1214_v46  ;;  %v1257_v52 = vmul.f32 %v1256_v56, %v1232_v12  ;;  %v1284_v1 = vmul.f32 %v2227_v31, %v3384_v0  ;;  %v1294_v42 = vand.u32 2147483648, %v3384_v0 }
 0x1ee   :  { %v3424_v33 = vadd.f32 1.0, %v1321_v24  ;;  %v1345_v19 = vadd.f32 0.0036580483, %v1344_v26  ;;  %v1356_v62 = vadd.f32 0.014752088, %v1355_v59  ;;  %v1192_v61 = vmul.f32 %v3348_v18, %v3106_v63 }
 0x1ef   :  { %v1216_v3 = vsel %vm1213_vm3, %v1215_v20, %v1211_v45  ;;  %v1285_v22 = vsub.f32 1.0, %v1284_v1  ;;  %v1309_v51 = vadd.f32 0.18741608, %v1308_v17  ;;  %vm1570_vm4 = vcmp.eq.s32.totalorder %v2742_v29, 1 }
 0x1f0   :  { %v2127_v48 = vclamps-f32 %v1177_v50, 1.0  ;;  %v1271_v39 = vadd.f32 1.1283791, %v1270_v13  ;;  %v1292_v46 = vand.u32 2147483647, %v3384_v0  ;;  %2228 = vrcp.f32 %v3424_v33  ;;  %v3437_v50 = vpop.permute.xlu0 %1672  ;;  %v1556_v13 = vpop.permute.xlu2 %1555 }
 0x1f1   :  { %vm1571_vm5 = vcmp.eq.s32.totalorder %v2777_v21, 1  ;;  %v2129_v15 = vclamps-f32 %v1257_v52, 1.0  ;;  %v1286_v56 = vmul.f32 %v2227_v31, %v1285_v22  ;;  %vm1289_vm6 = vweird.f32 %v2227_v31 }
 0x1f2   :  { %v1357_v34 = vmul.f32 %v1356_v62, %v3386_v5  ;;  %v3433_v49 = vmul.f32 %v1216_v3, %v1192_v61  ;;  %vm1288_vm7 = vweird.f32 %v3384_v0  ;;  %v1295_v63 = vor.u32 1.1754944e-38, %v1294_v42 }
 0x1f3   :  { %v1346_v18 = vmul.f32 %v1345_v19, %v3386_v5  ;;  %v1287_v12 = vadd.f32 %v2227_v31, %v1286_v56  ;;  %v1310_v17 = vmul.f32 %v1309_v51, %v3316_v32  ;;  %v1595_v26 = vmin.f32 %v3223_v30, %v3420_v40  ;;  %vm1290_vm10 = vmor %vm1288_vm7, %vm1289_vm6 }
 0x1f4   :  { %v1358_v24 = vadd.f32 0.112945676, %v1357_v34  ;;  %vm1575_vm8 = vcmp.eq.s32.totalorder %v2868_v37, 1  ;;  %v1272_v45 = vmul.f32 %v1271_v39, %v3259_v8  ;;  %v1616_v0 = vsel %vm1563_vm14, %v2836_v57, -1e+30 }
 0x1f5   :  { %v1620_v59 = vsel %vm1567_vm9, %v3095_v44, -1e+30  ;;  %v3453_v32 = vsel %vm1566_vm1, %v2968_v47, 1e+30  ;;  %v1392_v30 = vadd.f32 1.0, %v2129_v15  ;;  %v1291_v40 = vsel %vm1290_vm10, %v2227_v31, %v1287_v12 }
 0x1f6   :  { %vm1293_vm11 = vcmp.eq.f32.partialorder %v1292_v46, 8.507059e+37  ;;  %v1359_v8 = vmul.f32 %v1358_v24, %v3386_v5  ;;  %v2229_v20 = vpop.eup %2228  ;;  %v1390_v52 = vadd.f32 1.0, %v2127_v48  ;;  %vm1707_vm12 = vcmp.eq.s32.totalorder %v3437_v50, 1 }
 0x1f7   :  { %v721_v38 = vmul.f32 0.5, %v3230_v54  ;;  %v1296_v1 = vsel %vm1293_vm11, %v1295_v63, %v1291_v40  ;;  %v1347_v42 = vadd.f32 0.05243302, %v1346_v18  ;;  %vm1569_vm14 = vcmp.eq.s32.totalorder %v2796_v58, 1 }
 0x1f8   :  { %v2128_v2 = vclamps-f32 %v3433_v49, 1.0  ;;  %v1297_v19 = vmul.f32 %v1296_v1, %v1272_v45  ;;  %vm1709_vm9 = vcmp.eq.s32.totalorder %v3314_v14, 1  ;;  %v1311_v62 = vadd.f32 1.1283791, %v1310_v17  ;;  %v3505_v40 = vpop.permute.xlu2 %1558 }
 0x1f9   :  { %v1324_v31 = vmul.f32 %v2229_v20, %v3424_v33  ;;  %vm1328_vm13 = vweird.f32 %v3424_v33  ;;  %v1334_v61 = vand.u32 2147483648, %v3424_v33  ;;  %v1360_v3 = vadd.f32 0.4994258, %v1359_v8 }
 0x1fa   :  { %v1632_v22 = vmax.f32 %v1616_v0, %v1620_v59  ;;  %v3465_v54 = vmul.f32 %v1392_v30, %v3351_v43  ;;  %v2130_v51 = vclamps-f32 %v1297_v19, 1.0  ;;  %v3470_v39 = vsel %vm1570_vm4, %v3097_v55, 1e+30 }
 0x1fb   :  { %v1325_v48 = vsub.f32 1.0, %v1324_v31  ;;  %v1348_v46 = vmul.f32 %v1347_v42, %v3386_v5  ;;  %v1361_v15 = vmul.f32 %v1360_v3, %v3386_v5  ;;  %v1587_v56 = vsel %vm1571_vm5, %v3360_v11, 1e+30 }
 0x1fc   :  { %v1598_v34 = vmin.f32 %v3453_v32, %v3470_v39  ;;  %v1393_v43 = vadd.f32 1.0, %v2130_v51  ;;  %vm1329_vm15 = vweird.f32 %v2229_v20  ;;  %v3482_v63 = vsel %vm1566_vm1, %v2968_v47, -1e+30 }
 0x1fd   :  { %v1326_v49 = vmul.f32 %v2229_v20, %v1325_v48  ;;  %v1332_v18 = vand.u32 2147483647, %v3424_v33  ;;  %v3485_v12 = vadd.f32 1.0, %v1361_v15  ;;  %vm1576_vm0 = vcmp.eq.s32.totalorder %v1556_v13, 1  ;;  %vm3497_vm1 = vmor %vm1328_vm13, %vm1329_vm15 }
 0x1fe   :  { %v1624_v17 = vsel %vm1571_vm5, %v3360_v11, -1e+30  ;;  %v3490_v24 = vmul.f32 %v1393_v43, %v721_v38  ;;  %v1335_v0 = vor.u32 1.1754944e-38, %v1334_v61  ;;  %v1591_v59 = vsel %vm1575_vm8, %v3465_v54, 1e+30 }
 0x1ff   :  { %v1327_v45 = vadd.f32 %v2229_v20, %v1326_v49  ;;  %v1349_v30 = vadd.f32 0.18741608, %v1348_v46  ;;  %2230 = vrcp.f32 %v3485_v12  ;;  %v1599_v13 = vmin.f32 %v1595_v26, %v1587_v56 }
 0x200   :  { %v1628_v21 = vsel %vm1575_vm8, %v3465_v54, -1e+30  ;;  %v1592_v38 = vsel %vm1576_vm0, %v3490_v24, 1e+30  ;;  %v1629_v33 = vsel %vm1576_vm0, %v3490_v24, -1e+30  ;;  %v1636_v1 = vmax.f32 %v1632_v22, %v1624_v17 }
 0x201   :  { %v1331_v8 = vsel %vm3497_vm1, %v2229_v20, %v1327_v45  ;;  %v3514_v42 = vsel %vm1569_vm14, %v3307_v16, 1e+30  ;;  %vm1333_vm2 = vcmp.eq.f32.partialorder %v1332_v18, 8.507059e+37  ;;  %v1603_v26 = vmin.f32 %v1599_v13, %v1591_v59  ;;  %v1691_v45 = vpop.permute.xlu2 %1690  ;;  %v3685_v13 = vld [vmem:[#allocation11_spill] sm:$0xff] }
 0x202   :  { %v1604_v37 = vmin.f32 %v3236_v25, %v1592_v38  ;;  %v1723_v19 = vsel %vm1707_vm12, %v3307_v16, 1e+30  ;;  %v1336_v31 = vsel %vm1333_vm2, %v1335_v0, %v1331_v8  ;;  %v1640_v20 = vmax.f32 %v1636_v1, %v1628_v21 }
 0x203   :  { %v1641_v61 = vmax.f32 %v3241_v7, %v1629_v33  ;;  %v3522_v3 = vmul.f32 %v1390_v52, %v3304_v35  ;;  %v1725_v22 = vsel %vm1709_vm9, %v3360_v11, 1e+30  ;;  %v1312_v51 = vmul.f32 %v1311_v62, %v3294_v9  ;;  %v1682_v62 = vpop.permute.xlu0 %1681 }
 0x204   :  { %v3528_v48 = vmin.f32 %v1603_v26, %v1604_v37  ;;  %v1391_v25 = vadd.f32 1.0, %v2128_v2  ;;  %vm1711_vm3 = vcmp.eq.s32.totalorder %v3362_v36, 1  ;;  %v1350_v46 = vmul.f32 %v1349_v30, %v3386_v5 }
 0x205   :  { %v3532_v15 = vmax.f32 %v1640_v20, %v1641_v61  ;;  %v2231_v56 = vpop.eup %2230  ;;  %v719_v7 = vmul.f32 0.5, %v3083_v4  ;;  %v1740_v35 = vmin.f32 %v1723_v19, %v3128_v41  ;;  %v1760_v52 = vsel %vm1707_vm12, %v3307_v16, -1e+30 }
 0x206   :  { %v1337_v43 = vmul.f32 %v1336_v31, %v1312_v51  ;;  %v1597_v9 = vmin.f32 %v3177_v10, %v3514_v42  ;;  %v1777_v2 = vmax.f32 %v1760_v52, %v3135_v6  ;;  %v1762_v36 = vsel %vm1709_vm9, %v3360_v11, -1e+30  ;;  %v3686_v31 = vld [vmem:[#allocation13_spill] sm:$0xff]  ;;  %v3688_v52 = vld [vmem:[#allocation18_spill] sm:$0xff] }
 0x207   :  { %v1364_v5 = vmul.f32 %v2231_v56, %v3485_v12  ;;  %vm1573_vm5 = vcmp.eq.s32.totalorder %v3277_v27, 1  ;;  %v1738_v4 = vmin.f32 %v1725_v22, %v1740_v35  ;;  %v1727_v41 = vsel %vm1711_vm3, %v3522_v3, 1e+30 }
 0x208   :  { %v1764_v50 = vsel %vm1711_vm3, %v3522_v3, -1e+30  ;;  %v3549_v49 = vmul.f32 %v1391_v25, %v719_v7  ;;  %v1351_v18 = vadd.f32 1.1283791, %v1350_v46  ;;  %vm1712_vm6 = vcmp.eq.s32.totalorder %v3399_v53, 1  ;;  %v3687_v46 = vld [vmem:[#allocation16_spill] sm:$0xff] }
 0x209   :  { %v1365_v10 = vsub.f32 1.0, %v1364_v5  ;;  %v2131_v6 = vclamps-f32 %v1337_v43, 1.0  ;;  %v1374_v14 = vand.u32 2147483648, %v3485_v12  ;;  %v3556_v17 = vsel %vm1570_vm4, %v3097_v55, -1e+30 }
 0x20a   :  { %vm1369_vm7 = vweird.f32 %v2231_v56  ;;  %v1372_v59 = vand.u32 2147483647, %v3485_v12  ;;  %v1635_v23 = vmax.f32 %v3482_v63, %v3556_v17  ;;  %v2290_v30 = vmov 1e+30  }
 0x20b   :  { %v1366_v0 = vmul.f32 %v2231_v56, %v1365_v10  ;;  %54 = vst [vmem:[#allocation3] sm:$0x3] %v2290_v30  ;;  %vm1574_vm8 = vcmp.eq.s32.totalorder %v3685_v13, 1  ;;  %v1589_v21 = vsel %vm1573_vm5, %v3522_v3, 1e+30  ;;  %v1775_v8 = vmax.f32 %v1762_v36, %v1777_v2  ;;  %v1694_v51 = vpop.permute.xlu0 %1693  ;;  %v3689_v2 = vld [vmem:[#allocation17_spill] sm:$0xff]  ;;  %v1697_v36 = vpop.permute.xlu2 %1696 }
 0x20c   :  { %v1622_v29 = vsel %vm1569_vm14, %v3307_v16, -1e+30  ;;  %v1741_v38 = vmin.f32 %v1727_v41, %v1738_v4  ;;  %vm1368_vm4 = vweird.f32 %v3485_v12  ;;  %v1728_v63 = vsel %vm1712_vm6, %v3549_v49, 1e+30 }
 0x20d   :  { %v1367_v33 = vadd.f32 %v2231_v56, %v1366_v0  ;;  %v1765_v1 = vsel %vm1712_vm6, %v3549_v49, -1e+30  ;;  %v1394_v42 = vadd.f32 1.0, %v2131_v6  ;;  %v1778_v26 = vmax.f32 %v1764_v50, %v1775_v8  ;;  %vm1370_vm10 = vmor %vm1368_vm4, %vm1369_vm7 }
 0x20e   :  { %v1375_v37 = vor.u32 1.1754944e-38, %v1374_v14  ;;  %vm1710_vm11 = vcmp.eq.s32.totalorder %v1682_v62, 1  ;;  %v1352_v58 = vmul.f32 %v1351_v18, %v3365_v28  ;;  %vm1373_vm12 = vcmp.eq.f32.partialorder %v1372_v59, 8.507059e+37 }
 0x20f   :  { %v1371_v19 = vsel %vm1370_vm10, %v2231_v56, %v1367_v33  ;;  %vm1578_vm14 = vcmp.eq.s32.totalorder %v3686_v31, 1  ;;  %v722_v12 = vmul.f32 0.5, %v3281_v60  ;;  %v1742_v61 = vmin.f32 %v1728_v63, %v1741_v38 }
 0x210   :  { %v1376_v20 = vsel %vm1373_vm12, %v1375_v37, %v1371_v19  ;;  %v1779_v22 = vmax.f32 %v1765_v1, %v1778_v26  ;;  %v2291_v53 = vmov -1e+30   ;;  %v1601_v25 = vmin.f32 %v1597_v9, %v1589_v21 }
 0x211   :  { %55 = vst [vmem:[#allocation4] sm:$0x3] %v2291_v53  ;;  %v1634_v7 = vmax.f32 %v3687_v46, %v1622_v29  ;;  %v1377_v35 = vmul.f32 %v1376_v20, %v1352_v58  ;;  %vm1713_vm9 = vcmp.eq.s32.totalorder %v1691_v45, 1  ;;  %v1626_v28 = vsel %vm1573_vm5, %v3522_v3, -1e+30 }
 0x212   :  { %v1410_v56 = vmul.f32 %v1394_v42, %v722_v12  ;;  %v723_v43 = vmul.f32 0.5, %v3688_v52  ;;  %v1726_v60 = vsel %vm1710_vm11, %v3689_v2, 1e+30  ;;  %v1763_v4 = vsel %vm1710_vm11, %v3689_v2, -1e+30 }
 0x213   :  { %v2132_v5 = vclamps-f32 %v1377_v35, 1.0  ;;  %vm1577_vm13 = vcmp.eq.s32.totalorder %v3505_v40, 1  ;;  %vm1714_vm15 = vcmp.eq.s32.totalorder %v1694_v51, 1  ;;  %v1745_v9 = vmin.f32 %v1726_v60, %v1742_v61  ;;  %v1700_v19 = vpop.permute.xlu2 %1699 }
 0x214   :  { %v1782_v41 = vmax.f32 %v1763_v4, %v1779_v22  ;;  %v1729_v50 = vsel %vm1713_vm9, %v3465_v54, 1e+30  ;;  %v1766_v27 = vsel %vm1713_vm9, %v3465_v54, -1e+30  ;;  %v1590_v10 = vsel %vm1574_vm8, %v3549_v49, 1e+30 }
 0x215   :  { %v1395_v18 = vadd.f32 1.0, %v2132_v5  ;;  %v1627_v6 = vsel %vm1574_vm8, %v3549_v49, -1e+30  ;;  %vm1715_vm0 = vcmp.eq.s32.totalorder %v1697_v36, 1  ;;  %v1638_v62 = vmax.f32 %v1634_v7, %v1626_v28 }
 0x216   :  { %v1593_v14 = vsel %vm1577_vm13, %v1410_v56, 1e+30  ;;  %v1730_v40 = vsel %vm1714_vm15, %v3490_v24, 1e+30  ;;  %v1767_v17 = vsel %vm1714_vm15, %v3490_v24, -1e+30  ;;  %v1743_v59 = vmin.f32 %v1729_v50, %v1745_v9 }
 0x217   :  { %v1411_v45 = vmul.f32 %v1395_v18, %v723_v43  ;;  %v1630_v0 = vsel %vm1577_vm13, %v1410_v56, -1e+30  ;;  %v1780_v30 = vmax.f32 %v1766_v27, %v1782_v41  ;;  %v1602_v21 = vmin.f32 %v1598_v34, %v1590_v10  ;;  %v1791_v10 = vld [vmem:[#allocation3] sm:$0x3] }
 0x218   :  { %v1639_v29 = vmax.f32 %v1635_v23, %v1627_v6  ;;  %v1731_v8 = vsel %vm1715_vm0, %v1410_v56, 1e+30  ;;  %v1768_v38 = vsel %vm1715_vm0, %v1410_v56, -1e+30  ;;  %v1744_v63 = vmin.f32 %v1730_v40, %v1743_v59  ;;  %v1796_v6 = vld [vmem:[#allocation4] sm:$0x3] }
 0x219   :  { %v1594_v13 = vsel %vm1578_vm14, %v1411_v45, 1e+30  ;;  %v1631_v33 = vsel %vm1578_vm14, %v1411_v45, -1e+30  ;;  %v1781_v1 = vmax.f32 %v1767_v17, %v1780_v30  ;;  %1461 = vmatpush.msra.mxu3 %v1411_v45  ;;  %v1605_v42 = vmin.f32 %v1601_v25, %v1593_v14  ;;  %v3690_v17 = vld [vmem:[#allocation15_spill] sm:$0xff] }
 0x21a   :  { %v1606_v26 = vmin.f32 %v1602_v21, %v1594_v13  ;;  %v1642_v37 = vmax.f32 %v1638_v62, %v1630_v0  ;;  %v1643_v58 = vmax.f32 %v1639_v29, %v1631_v33  ;;  %v1746_v12 = vmin.f32 %v1731_v8, %v1744_v63  ;;  %v1853_v0 = vld [vmem:[#allocation5 + $0xf8] sm:$0xff]  ;;  %v1851_v59 = vld [vmem:[#allocation5 + $0xe8] sm:$0xff]  ;;  %v1850_v30 = vld [vmem:[#allocation5 + $0xe0] sm:$0xff] }
 0x21b   :  { %v1783_v32 = vmax.f32 %v1768_v38, %v1781_v1  ;;  %vm1716_vm1 = vcmp.eq.s32.totalorder %v1700_v19, 1  ;;  %1462 = vmatpush.msra.mxu3 %v1410_v56  ;;  %vm1792_vm2 = vcmask 1040384   ;;  %v1849_v21 = vld [vmem:[#allocation5 + $0xd8] sm:$0xff]  ;;  %v1846_v29 = vld [vmem:[#allocation5 + $0xc0] sm:$0xff]  ;;  %v1844_v38 = vld [vmem:[#allocation5 + $0xb0] sm:$0xff] }
 0x21c   :  { %v1608_v39 = vmin.f32 %v1605_v42, %v1606_v26  ;;  %v1645_v34 = vmax.f32 %v1642_v37, %v1643_v58  ;;  %v1732_v23 = vsel %vm1716_vm1, %v1411_v45, 1e+30  ;;  %v1769_v20 = vsel %vm1716_vm1, %v1411_v45, -1e+30  ;;  %v1445_v45 = vpop.trf.xlu1  ;;  %v1845_v8 = vld [vmem:[#allocation5 + $0xb8] sm:$0xff]  ;;  %v1842_v13 = vld [vmem:[#allocation5 + $0xa0] sm:$0xff] }
 0x21d   :  { %v1747_v61 = vmin.f32 %v1732_v23, %v1746_v12  ;;  %v1784_v22 = vmax.f32 %v1769_v20, %v1783_v32  ;;  %1463 = vmatpush.msra.mxu3 %v3490_v24  ;;  %v1841_v33 = vld [vmem:[#allocation5 + $0x98] sm:$0xff]  ;;  %v1840_v63 = vld [vmem:[#allocation5 + $0x90] sm:$0xff]  ;;  %v1839_v1 = vld [vmem:[#allocation5 + $0x88] sm:$0xff]  ;;  %v2292_v23 = vmov 0.0  }
 0x21e   :  { %v1609_v31 = vmin.f32 %v3528_v48, %v1608_v39  ;;  %v1646_v51 = vmax.f32 %v3532_v15, %v1645_v34  ;;  %v1838_v42 = vld [vmem:[#allocation5 + $0x80] sm:$0xff]  ;;  %v1836_v26 = vld [vmem:[#allocation5 + $0x78] sm:$0xff]  ;;  %v1835_v58 = vld [vmem:[#allocation5 + $0x70] sm:$0xff]  ;;  %53 = vst [vmem:[#allocation2] sm:$0x3] %v2292_v23 }
 0x21f   :  { %v1748_v53 = vrot.slane %v1747_v61, 4  ;;  %v1785_v25 = vrot.slane %v1784_v22, 4  ;;  %1464 = vmatpush.msra.mxu3 %v3465_v54  ;;  %v1834_v12 = vld [vmem:[#allocation5 + $0x68] sm:$0xff]  ;;  %v1833_v32 = vld [vmem:[#allocation5 + $0x60] sm:$0xff]  ;;  %v1832_v39 = vld [vmem:[#allocation5 + $0x58] sm:$0xff] }
 0x220   :  { %v1610_v46 = vrot.slane %v1609_v31, 4  ;;  %v1647_v7 = vrot.slane %v1646_v51, 4  ;;  %v1831_v34 = vld [vmem:[#allocation5 + $0x50] sm:$0xff]  ;;  %v1830_v20 = vld [vmem:[#allocation5 + $0x48] sm:$0xff] }
 0x221   :  { %v1749_v35 = vmin.f32 %v1747_v61, %v1748_v53  ;;  %v1786_v28 = vmax.f32 %v1784_v22, %v1785_v25  ;;  %1465 = vmatpush.msra.mxu3 %v3549_v49  ;;  %v1829_v61 = vld [vmem:[#allocation5 + $0x40] sm:$0xff]  ;;  %v1828_v22 = vld [vmem:[#allocation5 + $0x38] sm:$0xff] }
 0x222   :  { %v1611_v56 = vmin.f32 %v1609_v31, %v1610_v46  ;;  %v1648_v52 = vmax.f32 %v1646_v51, %v1647_v7  ;;  %v1827_v31 = vld [vmem:[#allocation5 + $0x30] sm:$0xff]  ;;  %v1826_v51 = vld [vmem:[#allocation5 + $0x28] sm:$0xff]  ;;  %v1825_v53 = vld [vmem:[#allocation5 + $0x20] sm:$0xff] }
 0x223   :  { %v1750_v43 = vrot.slane %v1749_v35, 2  ;;  %v1787_v60 = vrot.slane %v1786_v28, 2  ;;  %1466 = vmatpush.msra.mxu3 %v3522_v3  ;;  %v1824_v25 = vld [vmem:[#allocation5 + $0x18] sm:$0xff]  ;;  %v1823_v46 = vld [vmem:[#allocation5 + $0x10] sm:$0xff]  ;;  %v1822_v7 = vld [vmem:[#allocation5 + $0x8] sm:$0xff] }
 0x224   :  { %v1612_v24 = vrot.slane %v1611_v56, 2  ;;  %v1649_v48 = vrot.slane %v1648_v52, 2 }
 0x225   :  { %v1751_v36 = vmin.f32 %v1749_v35, %v1750_v43  ;;  %v1788_v15 = vmax.f32 %v1786_v28, %v1787_v60  ;;  %1467 = vmatpush.msra.mxu3 %v3689_v2  ;;  %v1821_v35 = vld [vmem:[#allocation5] sm:$0xff]  ;;  %v1910_v28 = vld [vmem:[#allocation5 + $0x178] sm:$0xff] }
 0x226   :  { %v1613_v5 = vmin.f32 %v1611_v56, %v1612_v24  ;;  %v1650_v54 = vmax.f32 %v1648_v52, %v1649_v48  ;;  %v1909_v56 = vld [vmem:[#allocation5 + $0x170] sm:$0xff]  ;;  %v1908_v52 = vld [vmem:[#allocation5 + $0x168] sm:$0xff]  ;;  %v1907_v43 = vld [vmem:[#allocation5 + $0x160] sm:$0xff] }
 0x227   :  { %v1752_v4 = vrot.slane %v1751_v36, 1  ;;  %v1789_v9 = vrot.slane %v1788_v15, 1  ;;  %1468 = vmatpush.msra.mxu3 %v3360_v11  ;;  %v3692_v11 = vld [vmem:[#allocation14_spill] sm:$0xff]  ;;  %v1905_v24 = vld [vmem:[#allocation5 + $0x150] sm:$0xff]  ;;  %v1904_v48 = vld [vmem:[#allocation5 + $0x148] sm:$0xff] }
 0x228   :  { %v1614_v41 = vrot.slane %v1613_v5, 1  ;;  %v1651_v49 = vrot.slane %v1650_v54, 1  ;;  %v1906_v60 = vld [vmem:[#allocation5 + $0x158] sm:$0xff] }
 0x229   :  { %1469 = vmatpush.msra.mxu3 %v3097_v55  ;;  %v1753_v3 = vmin.f32 %v1751_v36, %v1752_v4  ;;  %v1790_v18 = vmax.f32 %v1788_v15, %v1789_v9  ;;  %v3691_v55 = vld [vmem:[#allocation12_spill] sm:$0xff]  ;;  %v1903_v36 = vld [vmem:[#allocation5 + $0x140] sm:$0xff]  ;;  %v1902_v15 = vld [vmem:[#allocation5 + $0x138] sm:$0xff] }
 0x22a   :  { %v1615_v50 = vmin.f32 %v1613_v5, %v1614_v41  ;;  %v1652_v27 = vmax.f32 %v1650_v54, %v1651_v49  ;;  %v1901_v5 = vld [vmem:[#allocation5 + $0x130] sm:$0xff]  ;;  %v1900_v54 = vld [vmem:[#allocation5 + $0x128] sm:$0xff]  ;;  %v1899_v4 = vld [vmem:[#allocation5 + $0x120] sm:$0xff] }
 0x22b   :  { %1470 = vmatpush.msra.mxu3 %v3307_v16  ;;  %v1852_v16 = vld [vmem:[#allocation5 + $0xf0] sm:$0xff]  ;;  %v1898_v9 = vld [vmem:[#allocation5 + $0x118] sm:$0xff]  ;;  %v1896_v49 = vld [vmem:[#allocation5 + $0x108] sm:$0xff] }
 0x22c   :  { %v1793_v2 = vsel %vm1792_vm2, %v1615_v50, %v1753_v3  ;;  %v1797_v62 = vsel %vm1792_vm2, %v1652_v27, %v1790_v18  ;;  %v1897_v41 = vld [vmem:[#allocation5 + $0x110] sm:$0xff]  ;;  %v1895_v50 = vld [vmem:[#allocation5 + $0x100] sm:$0xff]  ;;  %v1428_v27 = vld [vmem:[#allocation2] sm:$0x3] }
 0x22d   :  { %v1794_v14 = vmin.f32 %v1791_v10, %v1793_v2  ;;  %v1798_v40 = vmax.f32 %v1796_v6, %v1797_v62  ;;  %1471 = vmatpush.msra.mxu3 %v3690_v17  ;;  %v1809_v10 = vpop.permute.xlu2 %1808 }
 0x22f   :  { %1795 = vst [vmem:[#allocation3] sm:$0x3] %v1794_v14  ;;  %1472 = vmatpush.msra.mxu3 %v3095_v44  ;;  %v1848_v44 = vld [vmem:[#allocation5 + $0xd0] sm:$0xff] }
 0x230   :  { %1799 = vst [vmem:[#allocation4] sm:$0x3] %v1798_v40 }
 0x231   :  { %1473 = vmatpush.msra.mxu3 %v2968_v47  ;;  %v1847_v47 = vld [vmem:[#allocation5 + $0xc8] sm:$0xff] }
 0x233   :  { %1474 = vmatpush.msra.mxu3 %v3691_v55  ;;  %v2199_v55 = vld [vmem:[%s3643_s8] ss:$0 sm:$0xff] }
 0x235   :  { %1475 = vmatpush.msra.mxu3 %v3692_v11 }
 0x236   :  { %v1812_v19 = vld [vmem:[#allocation3] sm:$0x3] }
 0x237   :  { %1476 = vmatpush.msra.mxu3 %v2836_v57  ;;  %v1843_v57 = vld [vmem:[#allocation5 + $0xa8] sm:$0xff]  ;;  %v1819_v62 = vld [vmem:[#allocation4] sm:$0x3] }
 0x238   :  { %1477 = vmatmul.f32.vlgmr.msra.gmra.mxu3 %v1445_v45 }
 0x239   :  { %1854 = vmatpush.msrb.mxu3 %v1853_v0 }
 0x23b   :  { %1855 = vmatpush.msrb.mxu3 %v1852_v16 }
 0x23d   :  { %1856 = vmatpush.msrb.mxu3 %v1851_v59 }
 0x23f   :  { %1857 = vmatpush.msrb.mxu3 %v1850_v30 }
 0x241   :  { %1858 = vmatpush.msrb.mxu3 %v1849_v21 }
 0x243   :  { %1859 = vmatpush.msrb.mxu3 %v1848_v44 }
 0x245   :  { %1860 = vmatpush.msrb.mxu3 %v1847_v47 }
 0x247   :  { %1861 = vmatpush.msrb.mxu3 %v1846_v29 }
 0x249   :  { %1862 = vmatpush.msrb.mxu3 %v1845_v8 }
 0x24b   :  { %1863 = vmatpush.msrb.mxu3 %v1844_v38 }
 0x24d   :  { %1864 = vmatpush.msrb.mxu3 %v1843_v57 }
 0x24f   :  { %1865 = vmatpush.msrb.mxu3 %v1842_v13 }
 0x251   :  { %1866 = vmatpush.msrb.mxu3 %v1841_v33 }
 0x253   :  { %1867 = vmatpush.msrb.mxu3 %v1840_v63 }
 0x255   :  { %1868 = vmatpush.msrb.mxu3 %v1839_v1 }
 0x256   :  { %v3622_v37 = vpop.permute.xlu0 %1815 }
 0x257   :  { %1869 = vmatpush.msrb.mxu3 %v1838_v42  ;;  %vm1817_vm3 = vcmp.eq.s32.totalorder %v3622_v37, 1 }
 0x258   :  { %2133 = vmatmul.msk.f32.vlgmr.msrb.gmra.mxu3 %vm1817_vm3, %v1812_v19 }
 0x259   :  { %1874 = vmatpush.msra.mxu3 %v1836_v26 }
 0x25b   :  { %1875 = vmatpush.msra.mxu3 %v1835_v58 }
 0x25d   :  { %1876 = vmatpush.msra.mxu3 %v1834_v12 }
 0x25f   :  { %1877 = vmatpush.msra.mxu3 %v1833_v32 }
 0x261   :  { %1878 = vmatpush.msra.mxu3 %v1832_v39 }
 0x263   :  { %1879 = vmatpush.msra.mxu3 %v1831_v34 }
 0x265   :  { %1880 = vmatpush.msra.mxu3 %v1830_v20 }
 0x267   :  { %1881 = vmatpush.msra.mxu3 %v1829_v61 }
 0x269   :  { %1882 = vmatpush.msra.mxu3 %v1828_v22 }
 0x26b   :  { %1883 = vmatpush.msra.mxu3 %v1827_v31 }
 0x26d   :  { %1884 = vmatpush.msra.mxu3 %v1826_v51 }
 0x26f   :  { %1885 = vmatpush.msra.mxu3 %v1825_v53 }
 0x271   :  { %1886 = vmatpush.msra.mxu3 %v1824_v25 }
 0x273   :  { %1887 = vmatpush.msra.mxu3 %v1823_v46 }
 0x275   :  { %1888 = vmatpush.msra.mxu3 %v1822_v7 }
 0x277   :  { %1889 = vmatpush.msra.mxu3 %v1821_v35 }
 0x279   :  { %1911 = vmatpush.msrb.mxu3 %v1910_v28 }
 0x27b   :  { %1912 = vmatpush.msrb.mxu3 %v1909_v56 }
 0x27d   :  { %1913 = vmatpush.msrb.mxu3 %v1908_v52 }
 0x27f   :  { %1914 = vmatpush.msrb.mxu3 %v1907_v43 }
 0x281   :  { %1915 = vmatpush.msrb.mxu3 %v1906_v60 }
 0x283   :  { %1916 = vmatpush.msrb.mxu3 %v1905_v24 }
 0x285   :  { %1917 = vmatpush.msrb.mxu3 %v1904_v48 }
 0x287   :  { %1918 = vmatpush.msrb.mxu3 %v1903_v36 }
 0x289   :  { %1919 = vmatpush.msrb.mxu3 %v1902_v15 }
 0x28b   :  { %1920 = vmatpush.msrb.mxu3 %v1901_v5 }
 0x28d   :  { %1921 = vmatpush.msrb.mxu3 %v1900_v54 }
 0x28f   :  { %1922 = vmatpush.msrb.mxu3 %v1899_v4 }
 0x291   :  { %1923 = vmatpush.msrb.mxu3 %v1898_v9 }
 0x293   :  { %1924 = vmatpush.msrb.mxu3 %v1897_v41 }
 0x295   :  { %1925 = vmatpush.msrb.mxu3 %v1896_v49 }
 0x297   :  { %1926 = vmatpush.msrb.mxu3 %v1895_v50 }
 0x2bb   :  { %v1478_v3 = vpop.f32.mrf.mxu3 }
 0x2bc   :  { %v1481_v18 = vadd.f32 %v1478_v3, %v1428_v27 }
 0x2be   :  { %1482 = vst [vmem:[#allocation2] sm:$0x3] %v1481_v18 }
 0x2c5   :  { %v1805_v6 = vld [vmem:[#allocation2] sm:$0x3] }
 0x2c6   :  { %v1811_v2 = vmul.f32 %v1809_v10, %v1805_v6 }
 0x2c8   :  { %1890 = vmatmul.f32.vlgmr.msra.gmra.mxu3 %v1811_v2 }
 0x2d0   :  { %2134 = vmatmul.msk.f32.vlgmr.msrb.gmra.mxu3 %vm1817_vm3, %v1819_v62 }
 0x2db   :  { %v1871_v14 = vpop.f32.mrf.mxu3 }
 0x34b   :  { %v1891_v40 = vpop.f32.mrf.mxu3 }
 0x34c   :  { %v1892_v17 = vadd.f32 %v1891_v40, %v1871_v14 }
 0x353   :  { %v1928_v11 = vpop.f32.mrf.mxu3 }
 0x354   :  { %v1931_v45 = vadd.f32 %v1928_v11, %v1892_v17 }
 0x356   :  { %v1936_v0 = vadd.f32 %v2199_v55, %v1931_v45 }
 0x358   :  { %1937 = vst [vmem:[#allocation8] sm:$0x3] %v1936_v0 }
 0x359   :  { %1948 = dma.vmem_to_hbm [thread:$0]  %s1944_s5, 32, %s1946_s2, [#allocation7]  }
 0x35a   :  { %2283 = dma.done.wait [#allocation7], 32  }
 0x35b   :  { %2284 = vsyncadd [#allocation7], 4294967264 }
 0x35c   :  { %1953 = vsyncpa [#allocation6], 1 }
 0x35d   :  { %1954 = vsyncpa [#allocation7], 1 }

</bundles_post_ra>
